<compile_context>
chip_gen: v7x
topology: tpu7x:2x2x1
jax: 0.10.0
libtpu: 0.0.40
codegen_flags: <defaults>
</compile_context>

<pallas_src>
import functools

import numpy as np
import jax
import jax.numpy as jnp
from jax import lax
from jax.experimental import pallas as pl
from jax.experimental.pallas import tpu as pltpu

KSIZE = 4                       # both convs: kernel_size=4, stride=2, padding=1
BN_EPS = 1e-5
VMEM_LIMIT = 32 * 1024 * 1024   # explicit scoped-VMEM (v5e default is 16 MiB);
                                # can be raised to 64-96 MiB on v6e (128 MiB phys).


# ------------------------------ Pallas kernel ------------------------------- #

def _fused_unet_kernel(xs_ref, mask_ref, wd_ref, wu_ref, up_ref, stats_ref,
                       h_scr, *, wq):
    """One batch image per grid step.

    LeakyReLU(0.2) -> Conv2d(4,s2,p1) -> ReLU -> ConvTranspose2d(4,s2,p1)
    plus per-image BatchNorm partial sums (sum, sum of squares).

    Layout: spatial is flattened onto the sublane axis as an (Ho+1, Wo+1)
    compute grid (last row/col are padding, masked to zero); channels live on
    the lane axis.  Conv taps are read with static sublane rotations of the
    flat grid, so no im2col matrix ever exists in HBM or VMEM.
    """
    gdt = wd_ref.dtype                      # bf16 on v6e/v7x, f32 for validation
    mq = xs_ref.shape[1]                    # (Ho+1)*(Wo+1)
    mask = mask_ref[...]                    # (Mq, 1) f32, 1 on valid pixels

    def tap(v, shift):
        # out[p, :] = v[(p + shift) % Mq, :]   (static shift, sublane axis)
        s = shift % mq
        if s == 0:
            return v
        return jnp.concatenate([v[s:, :], v[:s, :]], axis=0)

    # ---- down path: LeakyReLU -> Conv2d(k4,s2,p1) as 4 tap-GEMMs -> ReLU ----
    x = xs_ref[0]                                           # (Mq, 4*Cin) f32
    x = jnp.where(x >= 0, x, 0.2 * x)                       # LReLU once per elem
    xg = x.astype(gdt)                                      # cast only for MXU
    acc = jnp.zeros((mq, h_scr.shape[1]), jnp.float32)
    for a in range(2):
        for b in range(2):
            acc = acc + jnp.dot(tap(xg, a * wq + b), wd_ref[a * 2 + b],
                                preferred_element_type=jnp.float32)
    # ReLU; zero the pad row/col so the up-conv taps read zeros there.
    h_scr[...] = jnp.maximum(acc, 0.0) * mask               # h stays in VMEM

    # ---- up path: ConvTranspose2d(k4,s2,p1), 4 output parities x 4 taps -----
    hg = h_scr[...].astype(gdt)                             # (Mq, inner_nc)
    rolled = {(dh, dw): tap(hg, dh * wq + dw)               # 9 shifts shared by
              for dh in (-1, 0, 1) for dw in (-1, 0, 1)}    # the 16 sub-GEMMs

    co = up_ref.shape[3]
    s_acc = jnp.zeros((1, co), jnp.float32)
    ss_acc = jnp.zeros((1, co), jnp.float32)
    for py in range(2):
        for px in range(2):
            p = py * 2 + px
            u = jnp.zeros((mq, co), jnp.float32)
            for dy in range(2):
                for dx in range(2):
                    u = u + jnp.dot(rolled[(py + dy - 1, px + dx - 1)],
                                    wu_ref[p * 4 + dy * 2 + dx],
                                    preferred_element_type=jnp.float32)
            u = u * mask                                    # zero pad row/col
            up_ref[0, p] = u                                # raw (pre-BN) output
            s_acc = s_acc + jnp.sum(u, axis=0, keepdims=True)
            ss_acc = ss_acc + jnp.sum(u * u, axis=0, keepdims=True)
    stats_ref[0] = jnp.concatenate([s_acc, ss_acc], axis=0)  # (2, outer_nc)


# ----------------------------- pallas_call wrapper --------------------------- #

def _fused_call(xs, mask, wd, wu, *, inner_nc, outer_nc, wq):
    n, mq, c4 = xs.shape
    kern = functools.partial(_fused_unet_kernel, wq=wq)
    return pl.pallas_call(
        kern,
        out_shape=(jax.ShapeDtypeStruct((n, 4, mq, outer_nc), jnp.float32),
                   jax.ShapeDtypeStruct((n, 2, outer_nc), jnp.float32)),
        grid=(n,),
        in_specs=[pl.BlockSpec((1, mq, c4), lambda b: (b, 0, 0)),
                  pl.BlockSpec((mq, 1), lambda b: (0, 0)),
                  # constant block index -> Pallas keeps the weights resident;
                  # TODO(synk): pipeline_mode=pl.Buffered(1) to drop 2nd buffer.
                  pl.BlockSpec(wd.shape, lambda b: (0, 0, 0)),
                  pl.BlockSpec(wu.shape, lambda b: (0, 0, 0))],
        out_specs=(pl.BlockSpec((1, 4, mq, outer_nc), lambda b: (b, 0, 0, 0)),
                   pl.BlockSpec((1, 2, outer_nc), lambda b: (b, 0, 0))),
        scratch_shapes=[pltpu.VMEM((mq, inner_nc), jnp.float32)],
        compiler_params=pltpu.CompilerParams(
            dimension_semantics=("parallel",),
            vmem_limit_bytes=VMEM_LIMIT),
    )(xs, mask, wd, wu)


# ------------------------------ parameter prep ------------------------------- #

def prepare_params(params, gemm_dtype=jnp.bfloat16):
    """One-time weight preprocessing (hoisted out of the per-call forward)."""
    Wd = jnp.asarray(params["down_w"], jnp.float32)   # (inner_nc, outer_nc, 4, 4)
    Wu = jnp.asarray(params["up_w"], jnp.float32)     # (inner_nc, outer_nc, 4, 4)

    # Down conv as a 2x2 stride-1 conv over the space-to-depth'd padded input:
    #   h[i,j,o] = sum_{a,b} sum_{c4} xs[i+a, j+b, c4] * Wd2[a*2+b][c4, o]
    #   with c4 = (py*2+px)*C + c  and  Wd2 tap = Wd[o, c, 2a+py, 2b+px].
    taps = []
    for a in range(2):
        for b in range(2):
            parts = [Wd[:, :, 2 * a + py, 2 * b + px]        # (inner, outer)
                     for py in range(2) for px in range(2)]
            taps.append(jnp.concatenate(parts, axis=1).T)    # (4*outer, inner)
    wd2 = jnp.stack(taps, axis=0).astype(gemm_dtype)         # (4, 4*outer, inner)

    # ConvTranspose as 4 output parities x 4 taps of 1x1 kernels:
    #   up_{py,px}[i,j,co] = sum_{dy,dx} sum_{ci}
    #        h[i+py+dy-1, j+px+dx-1, ci] * Wu[ci, co, 3-2dy-py, 3-2dx-px]
    subs = [Wu[:, :, 3 - 2 * dy - py, 3 - 2 * dx - px]       # (inner, outer)
            for py in range(2) for px in range(2)
            for dy in range(2) for dx in range(2)]
    wu2 = jnp.stack(subs, axis=0).astype(gemm_dtype)         # (16, inner, outer)

    return {"wd": wd2, "wu": wu2,
            "gamma": jnp.asarray(params["bn_gamma"], jnp.float32),
            "beta": jnp.asarray(params["bn_beta"], jnp.float32)}


# ------------------------------ forward pass --------------------------------- #

def unet_innermost_forward(x, prep):
    """x: (N, outer_nc, H, W) -> (N, 2*outer_nc, H, W)."""
    N, C, H, W = x.shape
    c4, inner_nc = prep["wd"].shape[1], prep["wd"].shape[2]
    outer_nc = prep["wu"].shape[2]
    assert c4 == 4 * C and H % 2 == 0 and W % 2 == 0
    Ho, Wo = H // 2, W // 2
    Hq, Wq = Ho + 1, Wo + 1
    Mq = Hq * Wq

    # Layout-only input prep (pad + space-to-depth + flatten spatial): ~1.25x
    # bytes of x, replacing the 4x-amplified im2col matrix of the old version.
    xp = jnp.pad(x, ((0, 0), (0, 0), (1, 1), (1, 1)))
    xs = (xp.reshape(N, C, Hq, 2, Wq, 2)
            .transpose(0, 2, 4, 3, 5, 1)                  # (N, i, j, py, px, c)
            .reshape(N, Mq, 4 * C))

    # Static validity mask of the (Hq, Wq) compute grid (drop the pad row/col).
    valid = (np.arange(Hq)[:, None] < Ho) & (np.arange(Wq)[None, :] < Wo)
    mask = jnp.asarray(valid.reshape(Mq, 1), jnp.float32)

    up_raw, stats = _fused_call(xs, mask, prep["wd"], prep["wu"],
                                inner_nc=inner_nc, outer_nc=outer_nc, wq=Wq)

    # BatchNorm2d (training-mode batch statistics) finalized from the per-image
    # partial sums emitted by the kernel (cross-tile accumulation, f32 math).
    count = float(N * 4 * Ho * Wo)                        # = N * 2Ho * 2Wo
    ssum = stats[:, 0, :].sum(axis=0)                     # (outer_nc,)
    ssq = stats[:, 1, :].sum(axis=0)
    mean = ssum / count
    var = ssq / count - mean * mean                       # biased variance
    scale = prep["gamma"] * lax.rsqrt(var + BN_EPS)
    shift = prep["beta"] - mean * scale

    # Normalize + drop pad row/col + interleave parities + skip-concat: one
    # fused XLA elementwise/layout epilogue pass over the output.
    u = up_raw.reshape(N, 2, 2, Hq, Wq, outer_nc)[:, :, :, :Ho, :Wo, :]
    u = u * scale + shift
    up = u.transpose(0, 5, 3, 1, 4, 2).reshape(N, outer_nc, 2 * Ho, 2 * Wo)

    # --- skip connection: torch.cat([model(x), x], dim=1) ---
    return jnp.concatenate([up, x], axis=1)


# ------------------- pure-JAX reference (validation only) -------------------- #

def reference_forward(x, params):
    Wd, Wu = params["down_w"], params["up_w"]
    gamma, beta = params["bn_gamma"], params["bn_beta"]
    h = jnp.where(x >= 0, x, 0.2 * x)
    d = jax.lax.conv_general_dilated(
        h, Wd, (2, 2), ((1, 1), (1, 1)),
        dimension_numbers=('NCHW', 'OIHW', 'NCHW'),
        precision=jax.lax.Precision.HIGHEST)
    d = jnp.maximum(d, 0.0)
    w_eq = jnp.flip(Wu, axis=(2, 3)).transpose(1, 0, 2, 3)
    u = jax.lax.conv_general_dilated(
        d, w_eq, (1, 1), ((2, 2), (2, 2)), lhs_dilation=(2, 2),
        dimension_numbers=('NCHW', 'OIHW', 'NCHW'),
        precision=jax.lax.Precision.HIGHEST)
    mean = u.mean(axis=(0, 2, 3), keepdims=True)
    var = ((u - mean) ** 2).mean(axis=(0, 2, 3), keepdims=True)
    un = ((u - mean) * jax.lax.rsqrt(var + BN_EPS)
          * gamma.reshape(1, -1, 1, 1) + beta.reshape(1, -1, 1, 1))
    return jnp.concatenate([un, x], axis=1)


if __name__ == "__main__":
    key = jax.random.PRNGKey(0)
    k1, k2, k3, k4, k5 = jax.random.split(key, 5)

    N, outer_nc, inner_nc, H, W = 2, 4, 8, 16, 16
    x = jax.random.normal(k1, (N, outer_nc, H, W), jnp.float32)
    params = {
        # Conv2d(outer_nc, inner_nc, 4) weight: (inner_nc, outer_nc, 4, 4)
        "down_w": 0.1 * jax.random.normal(k2, (inner_nc, outer_nc, KSIZE, KSIZE), jnp.float32),
        # ConvTranspose2d(inner_nc, outer_nc, 4) weight: (inner_nc, outer_nc, 4, 4)
        "up_w": 0.1 * jax.random.normal(k3, (inner_nc, outer_nc, KSIZE, KSIZE), jnp.float32),
        # BatchNorm2d(outer_nc) affine params
        "bn_gamma": 1.0 + 0.1 * jax.random.normal(k4, (outer_nc,), jnp.float32),
        "bn_beta": 0.1 * jax.random.normal(k5, (outer_nc,), jnp.float32),
    }

    ref = reference_forward(x, params)
    fwd = jax.jit(unet_innermost_forward)

    # f32 GEMM path (strict numerical check).
    prep32 = prepare_params(params, gemm_dtype=jnp.float32)
    out32 = jax.block_until_ready(fwd(x, prep32))
    assert out32.shape == (N, 2 * outer_nc, H, W), out32.shape
    np.testing.assert_allclose(np.asarray(out32), np.asarray(ref),
                               rtol=1e-3, atol=1e-3)

    # bf16 GEMM path (MXU-native on v6e/v7x; f32 accumulation + f32 BN math).
    prep16 = prepare_params(params, gemm_dtype=jnp.bfloat16)
    out16 = jax.block_until_ready(fwd(x, prep16))
    np.testing.assert_allclose(np.asarray(out16), np.asarray(ref),
                               rtol=5e-2, atol=5e-2)

    print("KERNEL_OK")
</pallas_src>

<mosaic_0001>
module attributes {stable_mosaic.version = 11 : i64} {
  func.func @_fused_unet_kernel(%arg0: i32, %arg1: memref<1x81x16xf32, #tpu.memory_space<vmem>>, %arg2: memref<81x1xf32, #tpu.memory_space<vmem>>, %arg3: memref<4x16x8xf32, #tpu.memory_space<vmem>>, %arg4: memref<16x8x4xf32, #tpu.memory_space<vmem>>, %arg5: memref<1x4x81x4xf32, #tpu.memory_space<vmem>>, %arg6: memref<1x2x4xf32, #tpu.memory_space<vmem>>, %arg7: memref<81x8xf32, #tpu.memory_space<vmem>>) attributes {dimension_semantics = [#tpu.dimension_semantics<parallel>], iteration_bounds = array<i64: 2>, scalar_prefetch = 0 : i64, scratch_operands = 1 : i64, tpu.core_type = #tpu.core_type<tc>, window_params = [{transform_indices = @transform_0, window_bounds = array<i64: 1, 81, 16>}, {pipeline_mode = #tpu.pipeline_mode<synchronous>, transform_indices = @transform_1, window_bounds = array<i64: 81, 1>}, {pipeline_mode = #tpu.pipeline_mode<synchronous>, transform_indices = @transform_2, window_bounds = array<i64: 4, 16, 8>}, {pipeline_mode = #tpu.pipeline_mode<synchronous>, transform_indices = @transform_3, window_bounds = array<i64: 16, 8, 4>}, {transform_indices = @transform_4, window_bounds = array<i64: 1, 4, 81, 4>}, {transform_indices = @transform_5, window_bounds = array<i64: 1, 2, 4>}]} {
    %c0 = arith.constant 0 : index
    %c0_0 = arith.constant 0 : index
    %0 = vector.load %arg2[%c0, %c0_0] : memref<81x1xf32, #tpu.memory_space<vmem>>, vector<81x1xf32>
    %c0_1 = arith.constant 0 : index
    %c0_2 = arith.constant 0 : index
    %c0_3 = arith.constant 0 : index
    %1 = vector.load %arg1[%c0_1, %c0_2, %c0_3] : memref<1x81x16xf32, #tpu.memory_space<vmem>>, vector<1x81x16xf32>
    %2 = vector.shape_cast %1 : vector<1x81x16xf32> to vector<81x16xf32>
    %cst = arith.constant 0.000000e+00 : f32
    %3 = vector.broadcast %cst : f32 to vector<81x16xf32>
    %4 = arith.cmpf oge, %2, %3 : vector<81x16xf32>
    %cst_4 = arith.constant 2.000000e-01 : f32
    %5 = vector.broadcast %cst_4 : f32 to vector<81x16xf32>
    %6 = arith.mulf %5, %2 : vector<81x16xf32>
    %7 = arith.select %4, %2, %6 : vector<81x16xi1>, vector<81x16xf32>
    %cst_5 = arith.constant 0.000000e+00 : f32
    %8 = vector.broadcast %cst_5 : f32 to vector<81x8xf32>
    %c0_6 = arith.constant 0 : index
    %c0_7 = arith.constant 0 : index
    %c0_8 = arith.constant 0 : index
    %9 = vector.load %arg3[%c0_6, %c0_7, %c0_8] : memref<4x16x8xf32, #tpu.memory_space<vmem>>, vector<1x16x8xf32>
    %10 = vector.shape_cast %9 : vector<1x16x8xf32> to vector<16x8xf32>
    %cst_9 = arith.constant dense<0.000000e+00> : vector<81x8xf32>
    %11 = tpu.matmul %7, %10, %cst_9 {dimension_numbers = #tpu.dot_dimension_numbers<[1], [0], [0], [1], [0, 0, 1, 1], [], []>} : vector<81x16xf32>, vector<16x8xf32>, vector<81x8xf32> -> vector<81x8xf32>
    %12 = arith.addf %8, %11 : vector<81x8xf32>
    %13 = vector.extract_strided_slice %7 {offsets = [1, 0], sizes = [80, 16], strides = [1, 1]} : vector<81x16xf32> to vector<80x16xf32>
    %14 = vector.extract_strided_slice %7 {offsets = [0, 0], sizes = [1, 16], strides = [1, 1]} : vector<81x16xf32> to vector<1x16xf32>
    %15 = tpu.concatenate %13, %14 in 0 : vector<80x16xf32>, vector<1x16xf32> -> vector<81x16xf32>
    %c1 = arith.constant 1 : index
    %c0_10 = arith.constant 0 : index
    %c0_11 = arith.constant 0 : index
    %16 = vector.load %arg3[%c1, %c0_10, %c0_11] : memref<4x16x8xf32, #tpu.memory_space<vmem>>, vector<1x16x8xf32>
    %17 = vector.shape_cast %16 : vector<1x16x8xf32> to vector<16x8xf32>
    %cst_12 = arith.constant dense<0.000000e+00> : vector<81x8xf32>
    %18 = tpu.matmul %15, %17, %cst_12 {dimension_numbers = #tpu.dot_dimension_numbers<[1], [0], [0], [1], [0, 0, 1, 1], [], []>} : vector<81x16xf32>, vector<16x8xf32>, vector<81x8xf32> -> vector<81x8xf32>
    %19 = arith.addf %12, %18 : vector<81x8xf32>
    %20 = vector.extract_strided_slice %7 {offsets = [9, 0], sizes = [72, 16], strides = [1, 1]} : vector<81x16xf32> to vector<72x16xf32>
    %21 = vector.extract_strided_slice %7 {offsets = [0, 0], sizes = [9, 16], strides = [1, 1]} : vector<81x16xf32> to vector<9x16xf32>
    %22 = tpu.concatenate %20, %21 in 0 : vector<72x16xf32>, vector<9x16xf32> -> vector<81x16xf32>
    %c2 = arith.constant 2 : index
    %c0_13 = arith.constant 0 : index
    %c0_14 = arith.constant 0 : index
    %23 = vector.load %arg3[%c2, %c0_13, %c0_14] : memref<4x16x8xf32, #tpu.memory_space<vmem>>, vector<1x16x8xf32>
    %24 = vector.shape_cast %23 : vector<1x16x8xf32> to vector<16x8xf32>
    %cst_15 = arith.constant dense<0.000000e+00> : vector<81x8xf32>
    %25 = tpu.matmul %22, %24, %cst_15 {dimension_numbers = #tpu.dot_dimension_numbers<[1], [0], [0], [1], [0, 0, 1, 1], [], []>} : vector<81x16xf32>, vector<16x8xf32>, vector<81x8xf32> -> vector<81x8xf32>
    %26 = arith.addf %19, %25 : vector<81x8xf32>
    %27 = vector.extract_strided_slice %7 {offsets = [10, 0], sizes = [71, 16], strides = [1, 1]} : vector<81x16xf32> to vector<71x16xf32>
    %28 = vector.extract_strided_slice %7 {offsets = [0, 0], sizes = [10, 16], strides = [1, 1]} : vector<81x16xf32> to vector<10x16xf32>
    %29 = tpu.concatenate %27, %28 in 0 : vector<71x16xf32>, vector<10x16xf32> -> vector<81x16xf32>
    %c3 = arith.constant 3 : index
    %c0_16 = arith.constant 0 : index
    %c0_17 = arith.constant 0 : index
    %30 = vector.load %arg3[%c3, %c0_16, %c0_17] : memref<4x16x8xf32, #tpu.memory_space<vmem>>, vector<1x16x8xf32>
    %31 = vector.shape_cast %30 : vector<1x16x8xf32> to vector<16x8xf32>
    %cst_18 = arith.constant dense<0.000000e+00> : vector<81x8xf32>
    %32 = tpu.matmul %29, %31, %cst_18 {dimension_numbers = #tpu.dot_dimension_numbers<[1], [0], [0], [1], [0, 0, 1, 1], [], []>} : vector<81x16xf32>, vector<16x8xf32>, vector<81x8xf32> -> vector<81x8xf32>
    %33 = arith.addf %26, %32 : vector<81x8xf32>
    %cst_19 = arith.constant 0.000000e+00 : f32
    %34 = vector.broadcast %cst_19 : f32 to vector<81x8xf32>
    %35 = arith.maximumf %33, %34 : vector<81x8xf32>
    %36 = vector.broadcast %0 : vector<81x1xf32> to vector<81x8xf32>
    %37 = arith.mulf %35, %36 : vector<81x8xf32>
    %c0_20 = arith.constant 0 : index
    %c0_21 = arith.constant 0 : index
    %38 = vector.load %arg7[%c0_20, %c0_21] : memref<81x8xf32, #tpu.memory_space<vmem>>, vector<81x8xf32>
    tpu.vector_store %arg7[%c0_20, %c0_21], %37 {strides = array<i32>} : memref<81x8xf32, #tpu.memory_space<vmem>>, vector<81x8xf32>,
    %c0_22 = arith.constant 0 : index
    %c0_23 = arith.constant 0 : index
    %39 = vector.load %arg7[%c0_22, %c0_23] : memref<81x8xf32, #tpu.memory_space<vmem>>, vector<81x8xf32>
    %40 = vector.extract_strided_slice %39 {offsets = [71, 0], sizes = [10, 8], strides = [1, 1]} : vector<81x8xf32> to vector<10x8xf32>
    %41 = vector.extract_strided_slice %39 {offsets = [0, 0], sizes = [71, 8], strides = [1, 1]} : vector<81x8xf32> to vector<71x8xf32>
    %42 = tpu.concatenate %40, %41 in 0 : vector<10x8xf32>, vector<71x8xf32> -> vector<81x8xf32>
    %43 = vector.extract_strided_slice %39 {offsets = [72, 0], sizes = [9, 8], strides = [1, 1]} : vector<81x8xf32> to vector<9x8xf32>
    %44 = vector.extract_strided_slice %39 {offsets = [0, 0], sizes = [72, 8], strides = [1, 1]} : vector<81x8xf32> to vector<72x8xf32>
    %45 = tpu.concatenate %43, %44 in 0 : vector<9x8xf32>, vector<72x8xf32> -> vector<81x8xf32>
    %46 = vector.extract_strided_slice %39 {offsets = [73, 0], sizes = [8, 8], strides = [1, 1]} : vector<81x8xf32> to vector<8x8xf32>
    %47 = vector.extract_strided_slice %39 {offsets = [0, 0], sizes = [73, 8], strides = [1, 1]} : vector<81x8xf32> to vector<73x8xf32>
    %48 = tpu.concatenate %46, %47 in 0 : vector<8x8xf32>, vector<73x8xf32> -> vector<81x8xf32>
    %49 = vector.extract_strided_slice %39 {offsets = [80, 0], sizes = [1, 8], strides = [1, 1]} : vector<81x8xf32> to vector<1x8xf32>
    %50 = vector.extract_strided_slice %39 {offsets = [0, 0], sizes = [80, 8], strides = [1, 1]} : vector<81x8xf32> to vector<80x8xf32>
    %51 = tpu.concatenate %49, %50 in 0 : vector<1x8xf32>, vector<80x8xf32> -> vector<81x8xf32>
    %52 = vector.extract_strided_slice %39 {offsets = [1, 0], sizes = [80, 8], strides = [1, 1]} : vector<81x8xf32> to vector<80x8xf32>
    %53 = vector.extract_strided_slice %39 {offsets = [0, 0], sizes = [1, 8], strides = [1, 1]} : vector<81x8xf32> to vector<1x8xf32>
    %54 = tpu.concatenate %52, %53 in 0 : vector<80x8xf32>, vector<1x8xf32> -> vector<81x8xf32>
    %55 = vector.extract_strided_slice %39 {offsets = [8, 0], sizes = [73, 8], strides = [1, 1]} : vector<81x8xf32> to vector<73x8xf32>
    %56 = vector.extract_strided_slice %39 {offsets = [0, 0], sizes = [8, 8], strides = [1, 1]} : vector<81x8xf32> to vector<8x8xf32>
    %57 = tpu.concatenate %55, %56 in 0 : vector<73x8xf32>, vector<8x8xf32> -> vector<81x8xf32>
    %58 = vector.extract_strided_slice %39 {offsets = [9, 0], sizes = [72, 8], strides = [1, 1]} : vector<81x8xf32> to vector<72x8xf32>
    %59 = vector.extract_strided_slice %39 {offsets = [0, 0], sizes = [9, 8], strides = [1, 1]} : vector<81x8xf32> to vector<9x8xf32>
    %60 = tpu.concatenate %58, %59 in 0 : vector<72x8xf32>, vector<9x8xf32> -> vector<81x8xf32>
    %61 = vector.extract_strided_slice %39 {offsets = [10, 0], sizes = [71, 8], strides = [1, 1]} : vector<81x8xf32> to vector<71x8xf32>
    %62 = vector.extract_strided_slice %39 {offsets = [0, 0], sizes = [10, 8], strides = [1, 1]} : vector<81x8xf32> to vector<10x8xf32>
    %63 = tpu.concatenate %61, %62 in 0 : vector<71x8xf32>, vector<10x8xf32> -> vector<81x8xf32>
    %cst_24 = arith.constant 0.000000e+00 : f32
    %64 = vector.broadcast %cst_24 : f32 to vector<1x4xf32>
    %cst_25 = arith.constant 0.000000e+00 : f32
    %65 = vector.broadcast %cst_25 : f32 to vector<1x4xf32>
    %cst_26 = arith.constant 0.000000e+00 : f32
    %66 = vector.broadcast %cst_26 : f32 to vector<81x4xf32>
    %c0_27 = arith.constant 0 : index
    %c0_28 = arith.constant 0 : index
    %c0_29 = arith.constant 0 : index
    %67 = vector.load %arg4[%c0_27, %c0_28, %c0_29] : memref<16x8x4xf32, #tpu.memory_space<vmem>>, vector<1x8x4xf32>
    %68 = vector.shape_cast %67 : vector<1x8x4xf32> to vector<8x4xf32>
    %cst_30 = arith.constant dense<0.000000e+00> : vector<81x4xf32>
    %69 = tpu.matmul %42, %68, %cst_30 {dimension_numbers = #tpu.dot_dimension_numbers<[1], [0], [0], [1], [0, 0, 1, 1], [], []>} : vector<81x8xf32>, vector<8x4xf32>, vector<81x4xf32> -> vector<81x4xf32>
    %70 = arith.addf %66, %69 : vector<81x4xf32>
    %c1_31 = arith.constant 1 : index
    %c0_32 = arith.constant 0 : index
    %c0_33 = arith.constant 0 : index
    %71 = vector.load %arg4[%c1_31, %c0_32, %c0_33] : memref<16x8x4xf32, #tpu.memory_space<vmem>>, vector<1x8x4xf32>
    %72 = vector.shape_cast %71 : vector<1x8x4xf32> to vector<8x4xf32>
    %cst_34 = arith.constant dense<0.000000e+00> : vector<81x4xf32>
    %73 = tpu.matmul %45, %72, %cst_34 {dimension_numbers = #tpu.dot_dimension_numbers<[1], [0], [0], [1], [0, 0, 1, 1], [], []>} : vector<81x8xf32>, vector<8x4xf32>, vector<81x4xf32> -> vector<81x4xf32>
    %74 = arith.addf %70, %73 : vector<81x4xf32>
    %c2_35 = arith.constant 2 : index
    %c0_36 = arith.constant 0 : index
    %c0_37 = arith.constant 0 : index
    %75 = vector.load %arg4[%c2_35, %c0_36, %c0_37] : memref<16x8x4xf32, #tpu.memory_space<vmem>>, vector<1x8x4xf32>
    %76 = vector.shape_cast %75 : vector<1x8x4xf32> to vector<8x4xf32>
    %cst_38 = arith.constant dense<0.000000e+00> : vector<81x4xf32>
    %77 = tpu.matmul %51, %76, %cst_38 {dimension_numbers = #tpu.dot_dimension_numbers<[1], [0], [0], [1], [0, 0, 1, 1], [], []>} : vector<81x8xf32>, vector<8x4xf32>, vector<81x4xf32> -> vector<81x4xf32>
    %78 = arith.addf %74, %77 : vector<81x4xf32>
    %c3_39 = arith.constant 3 : index
    %c0_40 = arith.constant 0 : index
    %c0_41 = arith.constant 0 : index
    %79 = vector.load %arg4[%c3_39, %c0_40, %c0_41] : memref<16x8x4xf32, #tpu.memory_space<vmem>>, vector<1x8x4xf32>
    %80 = vector.shape_cast %79 : vector<1x8x4xf32> to vector<8x4xf32>
    %cst_42 = arith.constant dense<0.000000e+00> : vector<81x4xf32>
    %81 = tpu.matmul %39, %80, %cst_42 {dimension_numbers = #tpu.dot_dimension_numbers<[1], [0], [0], [1], [0, 0, 1, 1], [], []>} : vector<81x8xf32>, vector<8x4xf32>, vector<81x4xf32> -> vector<81x4xf32>
    %82 = arith.addf %78, %81 : vector<81x4xf32>
    %83 = vector.broadcast %0 : vector<81x1xf32> to vector<81x4xf32>
    %84 = arith.mulf %82, %83 : vector<81x4xf32>
    %c0_43 = arith.constant 0 : index
    %c0_44 = arith.constant 0 : index
    %c0_45 = arith.constant 0 : index
    %c0_46 = arith.constant 0 : index
    %85 = vector.load %arg5[%c0_43, %c0_44, %c0_45, %c0_46] : memref<1x4x81x4xf32, #tpu.memory_space<vmem>>, vector<1x1x81x4xf32>
    %86 = vector.shape_cast %85 : vector<1x1x81x4xf32> to vector<81x4xf32>
    %87 = vector.shape_cast %84 : vector<81x4xf32> to vector<1x1x81x4xf32>
    tpu.vector_store %arg5[%c0_43, %c0_44, %c0_45, %c0_46], %87 {strides = array<i32>} : memref<1x4x81x4xf32, #tpu.memory_space<vmem>>, vector<1x1x81x4xf32>,
    %cst_47 = arith.constant dense<0.000000e+00> : vector<4xf32>
    %88 = vector.multi_reduction <add>, %84, %cst_47 [0] : vector<81x4xf32> to vector<4xf32>
    %89 = vector.shape_cast %88 : vector<4xf32> to vector<1x4xf32>
    %90 = arith.addf %64, %89 : vector<1x4xf32>
    %91 = arith.mulf %84, %84 : vector<81x4xf32>
    %cst_48 = arith.constant dense<0.000000e+00> : vector<4xf32>
    %92 = vector.multi_reduction <add>, %91, %cst_48 [0] : vector<81x4xf32> to vector<4xf32>
    %93 = vector.shape_cast %92 : vector<4xf32> to vector<1x4xf32>
    %94 = arith.addf %65, %93 : vector<1x4xf32>
    %cst_49 = arith.constant 0.000000e+00 : f32
    %95 = vector.broadcast %cst_49 : f32 to vector<81x4xf32>
    %c4 = arith.constant 4 : index
    %c0_50 = arith.constant 0 : index
    %c0_51 = arith.constant 0 : index
    %96 = vector.load %arg4[%c4, %c0_50, %c0_51] : memref<16x8x4xf32, #tpu.memory_space<vmem>>, vector<1x8x4xf32>
    %97 = vector.shape_cast %96 : vector<1x8x4xf32> to vector<8x4xf32>
    %cst_52 = arith.constant dense<0.000000e+00> : vector<81x4xf32>
    %98 = tpu.matmul %45, %97, %cst_52 {dimension_numbers = #tpu.dot_dimension_numbers<[1], [0], [0], [1], [0, 0, 1, 1], [], []>} : vector<81x8xf32>, vector<8x4xf32>, vector<81x4xf32> -> vector<81x4xf32>
    %99 = arith.addf %95, %98 : vector<81x4xf32>
    %c5 = arith.constant 5 : index
    %c0_53 = arith.constant 0 : index
    %c0_54 = arith.constant 0 : index
    %100 = vector.load %arg4[%c5, %c0_53, %c0_54] : memref<16x8x4xf32, #tpu.memory_space<vmem>>, vector<1x8x4xf32>
    %101 = vector.shape_cast %100 : vector<1x8x4xf32> to vector<8x4xf32>
    %cst_55 = arith.constant dense<0.000000e+00> : vector<81x4xf32>
    %102 = tpu.matmul %48, %101, %cst_55 {dimension_numbers = #tpu.dot_dimension_numbers<[1], [0], [0], [1], [0, 0, 1, 1], [], []>} : vector<81x8xf32>, vector<8x4xf32>, vector<81x4xf32> -> vector<81x4xf32>
    %103 = arith.addf %99, %102 : vector<81x4xf32>
    %c6 = arith.constant 6 : index
    %c0_56 = arith.constant 0 : index
    %c0_57 = arith.constant 0 : index
    %104 = vector.load %arg4[%c6, %c0_56, %c0_57] : memref<16x8x4xf32, #tpu.memory_space<vmem>>, vector<1x8x4xf32>
    %105 = vector.shape_cast %104 : vector<1x8x4xf32> to vector<8x4xf32>
    %cst_58 = arith.constant dense<0.000000e+00> : vector<81x4xf32>
    %106 = tpu.matmul %39, %105, %cst_58 {dimension_numbers = #tpu.dot_dimension_numbers<[1], [0], [0], [1], [0, 0, 1, 1], [], []>} : vector<81x8xf32>, vector<8x4xf32>, vector<81x4xf32> -> vector<81x4xf32>
    %107 = arith.addf %103, %106 : vector<81x4xf32>
    %c7 = arith.constant 7 : index
    %c0_59 = arith.constant 0 : index
    %c0_60 = arith.constant 0 : index
    %108 = vector.load %arg4[%c7, %c0_59, %c0_60] : memref<16x8x4xf32, #tpu.memory_space<vmem>>, vector<1x8x4xf32>
    %109 = vector.shape_cast %108 : vector<1x8x4xf32> to vector<8x4xf32>
    %cst_61 = arith.constant dense<0.000000e+00> : vector<81x4xf32>
    %110 = tpu.matmul %54, %109, %cst_61 {dimension_numbers = #tpu.dot_dimension_numbers<[1], [0], [0], [1], [0, 0, 1, 1], [], []>} : vector<81x8xf32>, vector<8x4xf32>, vector<81x4xf32> -> vector<81x4xf32>
    %111 = arith.addf %107, %110 : vector<81x4xf32>
    %112 = vector.broadcast %0 : vector<81x1xf32> to vector<81x4xf32>
    %113 = arith.mulf %111, %112 : vector<81x4xf32>
    %c0_62 = arith.constant 0 : index
    %c1_63 = arith.constant 1 : index
    %c0_64 = arith.constant 0 : index
    %c0_65 = arith.constant 0 : index
    %114 = vector.load %arg5[%c0_62, %c1_63, %c0_64, %c0_65] : memref<1x4x81x4xf32, #tpu.memory_space<vmem>>, vector<1x1x81x4xf32>
    %115 = vector.shape_cast %114 : vector<1x1x81x4xf32> to vector<81x4xf32>
    %116 = vector.shape_cast %113 : vector<81x4xf32> to vector<1x1x81x4xf32>
    tpu.vector_store %arg5[%c0_62, %c1_63, %c0_64, %c0_65], %116 {strides = array<i32>} : memref<1x4x81x4xf32, #tpu.memory_space<vmem>>, vector<1x1x81x4xf32>,
    %cst_66 = arith.constant dense<0.000000e+00> : vector<4xf32>
    %117 = vector.multi_reduction <add>, %113, %cst_66 [0] : vector<81x4xf32> to vector<4xf32>
    %118 = vector.shape_cast %117 : vector<4xf32> to vector<1x4xf32>
    %119 = arith.addf %90, %118 : vector<1x4xf32>
    %120 = arith.mulf %113, %113 : vector<81x4xf32>
    %cst_67 = arith.constant dense<0.000000e+00> : vector<4xf32>
    %121 = vector.multi_reduction <add>, %120, %cst_67 [0] : vector<81x4xf32> to vector<4xf32>
    %122 = vector.shape_cast %121 : vector<4xf32> to vector<1x4xf32>
    %123 = arith.addf %94, %122 : vector<1x4xf32>
    %cst_68 = arith.constant 0.000000e+00 : f32
    %124 = vector.broadcast %cst_68 : f32 to vector<81x4xf32>
    %c8 = arith.constant 8 : index
    %c0_69 = arith.constant 0 : index
    %c0_70 = arith.constant 0 : index
    %125 = vector.load %arg4[%c8, %c0_69, %c0_70] : memref<16x8x4xf32, #tpu.memory_space<vmem>>, vector<1x8x4xf32>
    %126 = vector.shape_cast %125 : vector<1x8x4xf32> to vector<8x4xf32>
    %cst_71 = arith.constant dense<0.000000e+00> : vector<81x4xf32>
    %127 = tpu.matmul %51, %126, %cst_71 {dimension_numbers = #tpu.dot_dimension_numbers<[1], [0], [0], [1], [0, 0, 1, 1], [], []>} : vector<81x8xf32>, vector<8x4xf32>, vector<81x4xf32> -> vector<81x4xf32>
    %128 = arith.addf %124, %127 : vector<81x4xf32>
    %c9 = arith.constant 9 : index
    %c0_72 = arith.constant 0 : index
    %c0_73 = arith.constant 0 : index
    %129 = vector.load %arg4[%c9, %c0_72, %c0_73] : memref<16x8x4xf32, #tpu.memory_space<vmem>>, vector<1x8x4xf32>
    %130 = vector.shape_cast %129 : vector<1x8x4xf32> to vector<8x4xf32>
    %cst_74 = arith.constant dense<0.000000e+00> : vector<81x4xf32>
    %131 = tpu.matmul %39, %130, %cst_74 {dimension_numbers = #tpu.dot_dimension_numbers<[1], [0], [0], [1], [0, 0, 1, 1], [], []>} : vector<81x8xf32>, vector<8x4xf32>, vector<81x4xf32> -> vector<81x4xf32>
    %132 = arith.addf %128, %131 : vector<81x4xf32>
    %c10 = arith.constant 10 : index
    %c0_75 = arith.constant 0 : index
    %c0_76 = arith.constant 0 : index
    %133 = vector.load %arg4[%c10, %c0_75, %c0_76] : memref<16x8x4xf32, #tpu.memory_space<vmem>>, vector<1x8x4xf32>
    %134 = vector.shape_cast %133 : vector<1x8x4xf32> to vector<8x4xf32>
    %cst_77 = arith.constant dense<0.000000e+00> : vector<81x4xf32>
    %135 = tpu.matmul %57, %134, %cst_77 {dimension_numbers = #tpu.dot_dimension_numbers<[1], [0], [0], [1], [0, 0, 1, 1], [], []>} : vector<81x8xf32>, vector<8x4xf32>, vector<81x4xf32> -> vector<81x4xf32>
    %136 = arith.addf %132, %135 : vector<81x4xf32>
    %c11 = arith.constant 11 : index
    %c0_78 = arith.constant 0 : index
    %c0_79 = arith.constant 0 : index
    %137 = vector.load %arg4[%c11, %c0_78, %c0_79] : memref<16x8x4xf32, #tpu.memory_space<vmem>>, vector<1x8x4xf32>
    %138 = vector.shape_cast %137 : vector<1x8x4xf32> to vector<8x4xf32>
    %cst_80 = arith.constant dense<0.000000e+00> : vector<81x4xf32>
    %139 = tpu.matmul %60, %138, %cst_80 {dimension_numbers = #tpu.dot_dimension_numbers<[1], [0], [0], [1], [0, 0, 1, 1], [], []>} : vector<81x8xf32>, vector<8x4xf32>, vector<81x4xf32> -> vector<81x4xf32>
    %140 = arith.addf %136, %139 : vector<81x4xf32>
    %141 = vector.broadcast %0 : vector<81x1xf32> to vector<81x4xf32>
    %142 = arith.mulf %140, %141 : vector<81x4xf32>
    %c0_81 = arith.constant 0 : index
    %c2_82 = arith.constant 2 : index
    %c0_83 = arith.constant 0 : index
    %c0_84 = arith.constant 0 : index
    %143 = vector.load %arg5[%c0_81, %c2_82, %c0_83, %c0_84] : memref<1x4x81x4xf32, #tpu.memory_space<vmem>>, vector<1x1x81x4xf32>
    %144 = vector.shape_cast %143 : vector<1x1x81x4xf32> to vector<81x4xf32>
    %145 = vector.shape_cast %142 : vector<81x4xf32> to vector<1x1x81x4xf32>
    tpu.vector_store %arg5[%c0_81, %c2_82, %c0_83, %c0_84], %145 {strides = array<i32>} : memref<1x4x81x4xf32, #tpu.memory_space<vmem>>, vector<1x1x81x4xf32>,
    %cst_85 = arith.constant dense<0.000000e+00> : vector<4xf32>
    %146 = vector.multi_reduction <add>, %142, %cst_85 [0] : vector<81x4xf32> to vector<4xf32>
    %147 = vector.shape_cast %146 : vector<4xf32> to vector<1x4xf32>
    %148 = arith.addf %119, %147 : vector<1x4xf32>
    %149 = arith.mulf %142, %142 : vector<81x4xf32>
    %cst_86 = arith.constant dense<0.000000e+00> : vector<4xf32>
    %150 = vector.multi_reduction <add>, %149, %cst_86 [0] : vector<81x4xf32> to vector<4xf32>
    %151 = vector.shape_cast %150 : vector<4xf32> to vector<1x4xf32>
    %152 = arith.addf %123, %151 : vector<1x4xf32>
    %cst_87 = arith.constant 0.000000e+00 : f32
    %153 = vector.broadcast %cst_87 : f32 to vector<81x4xf32>
    %c12 = arith.constant 12 : index
    %c0_88 = arith.constant 0 : index
    %c0_89 = arith.constant 0 : index
    %154 = vector.load %arg4[%c12, %c0_88, %c0_89] : memref<16x8x4xf32, #tpu.memory_space<vmem>>, vector<1x8x4xf32>
    %155 = vector.shape_cast %154 : vector<1x8x4xf32> to vector<8x4xf32>
    %cst_90 = arith.constant dense<0.000000e+00> : vector<81x4xf32>
    %156 = tpu.matmul %39, %155, %cst_90 {dimension_numbers = #tpu.dot_dimension_numbers<[1], [0], [0], [1], [0, 0, 1, 1], [], []>} : vector<81x8xf32>, vector<8x4xf32>, vector<81x4xf32> -> vector<81x4xf32>
    %157 = arith.addf %153, %156 : vector<81x4xf32>
    %c13 = arith.constant 13 : index
    %c0_91 = arith.constant 0 : index
    %c0_92 = arith.constant 0 : index
    %158 = vector.load %arg4[%c13, %c0_91, %c0_92] : memref<16x8x4xf32, #tpu.memory_space<vmem>>, vector<1x8x4xf32>
    %159 = vector.shape_cast %158 : vector<1x8x4xf32> to vector<8x4xf32>
    %cst_93 = arith.constant dense<0.000000e+00> : vector<81x4xf32>
    %160 = tpu.matmul %54, %159, %cst_93 {dimension_numbers = #tpu.dot_dimension_numbers<[1], [0], [0], [1], [0, 0, 1, 1], [], []>} : vector<81x8xf32>, vector<8x4xf32>, vector<81x4xf32> -> vector<81x4xf32>
    %161 = arith.addf %157, %160 : vector<81x4xf32>
    %c14 = arith.constant 14 : index
    %c0_94 = arith.constant 0 : index
    %c0_95 = arith.constant 0 : index
    %162 = vector.load %arg4[%c14, %c0_94, %c0_95] : memref<16x8x4xf32, #tpu.memory_space<vmem>>, vector<1x8x4xf32>
    %163 = vector.shape_cast %162 : vector<1x8x4xf32> to vector<8x4xf32>
    %cst_96 = arith.constant dense<0.000000e+00> : vector<81x4xf32>
    %164 = tpu.matmul %60, %163, %cst_96 {dimension_numbers = #tpu.dot_dimension_numbers<[1], [0], [0], [1], [0, 0, 1, 1], [], []>} : vector<81x8xf32>, vector<8x4xf32>, vector<81x4xf32> -> vector<81x4xf32>
    %165 = arith.addf %161, %164 : vector<81x4xf32>
    %c15 = arith.constant 15 : index
    %c0_97 = arith.constant 0 : index
    %c0_98 = arith.constant 0 : index
    %166 = vector.load %arg4[%c15, %c0_97, %c0_98] : memref<16x8x4xf32, #tpu.memory_space<vmem>>, vector<1x8x4xf32>
    %167 = vector.shape_cast %166 : vector<1x8x4xf32> to vector<8x4xf32>
    %cst_99 = arith.constant dense<0.000000e+00> : vector<81x4xf32>
    %168 = tpu.matmul %63, %167, %cst_99 {dimension_numbers = #tpu.dot_dimension_numbers<[1], [0], [0], [1], [0, 0, 1, 1], [], []>} : vector<81x8xf32>, vector<8x4xf32>, vector<81x4xf32> -> vector<81x4xf32>
    %169 = arith.addf %165, %168 : vector<81x4xf32>
    %170 = vector.broadcast %0 : vector<81x1xf32> to vector<81x4xf32>
    %171 = arith.mulf %169, %170 : vector<81x4xf32>
    %c0_100 = arith.constant 0 : index
    %c3_101 = arith.constant 3 : index
    %c0_102 = arith.constant 0 : index
    %c0_103 = arith.constant 0 : index
    %172 = vector.load %arg5[%c0_100, %c3_101, %c0_102, %c0_103] : memref<1x4x81x4xf32, #tpu.memory_space<vmem>>, vector<1x1x81x4xf32>
    %173 = vector.shape_cast %172 : vector<1x1x81x4xf32> to vector<81x4xf32>
    %174 = vector.shape_cast %171 : vector<81x4xf32> to vector<1x1x81x4xf32>
    tpu.vector_store %arg5[%c0_100, %c3_101, %c0_102, %c0_103], %174 {strides = array<i32>} : memref<1x4x81x4xf32, #tpu.memory_space<vmem>>, vector<1x1x81x4xf32>,
    %cst_104 = arith.constant dense<0.000000e+00> : vector<4xf32>
    %175 = vector.multi_reduction <add>, %171, %cst_104 [0] : vector<81x4xf32> to vector<4xf32>
    %176 = vector.shape_cast %175 : vector<4xf32> to vector<1x4xf32>
    %177 = arith.addf %148, %176 : vector<1x4xf32>
    %178 = arith.mulf %171, %171 : vector<81x4xf32>
    %cst_105 = arith.constant dense<0.000000e+00> : vector<4xf32>
    %179 = vector.multi_reduction <add>, %178, %cst_105 [0] : vector<81x4xf32> to vector<4xf32>
    %180 = vector.shape_cast %179 : vector<4xf32> to vector<1x4xf32>
    %181 = arith.addf %152, %180 : vector<1x4xf32>
    %182 = tpu.concatenate %177, %181 in 0 : vector<1x4xf32>, vector<1x4xf32> -> vector<2x4xf32>
    %c0_106 = arith.constant 0 : index
    %c0_107 = arith.constant 0 : index
    %c0_108 = arith.constant 0 : index
    %183 = vector.load %arg6[%c0_106, %c0_107, %c0_108] : memref<1x2x4xf32, #tpu.memory_space<vmem>>, vector<1x2x4xf32>
    %184 = vector.shape_cast %183 : vector<1x2x4xf32> to vector<2x4xf32>
    %185 = vector.shape_cast %182 : vector<2x4xf32> to vector<1x2x4xf32>
    tpu.vector_store %arg6[%c0_106, %c0_107, %c0_108], %185 {strides = array<i32>} : memref<1x2x4xf32, #tpu.memory_space<vmem>>, vector<1x2x4xf32>,
    return
  }
  func.func @transform_0(%arg0: i32) -> (i32, i32, i32) {
    %c0_i32 = arith.constant 0 : i32
    %c0_i32_0 = arith.constant 0 : i32
    %c0_i32_1 = arith.constant 0 : i32
    return %arg0, %c0_i32, %c0_i32_0 : i32, i32, i32
  }
  func.func @transform_1(%arg0: i32) -> (i32, i32) {
    %c0_i32 = arith.constant 0 : i32
    %c0_i32_0 = arith.constant 0 : i32
    %c0_i32_1 = arith.constant 0 : i32
    return %c0_i32, %c0_i32_0 : i32, i32
  }
  func.func @transform_2(%arg0: i32) -> (i32, i32, i32) {
    %c0_i32 = arith.constant 0 : i32
    %c0_i32_0 = arith.constant 0 : i32
    %c0_i32_1 = arith.constant 0 : i32
    %c0_i32_2 = arith.constant 0 : i32
    return %c0_i32, %c0_i32_0, %c0_i32_1 : i32, i32, i32
  }
  func.func @transform_3(%arg0: i32) -> (i32, i32, i32) {
    %c0_i32 = arith.constant 0 : i32
    %c0_i32_0 = arith.constant 0 : i32
    %c0_i32_1 = arith.constant 0 : i32
    %c0_i32_2 = arith.constant 0 : i32
    return %c0_i32, %c0_i32_0, %c0_i32_1 : i32, i32, i32
  }
  func.func @transform_4(%arg0: i32) -> (i32, i32, i32, i32) {
    %c0_i32 = arith.constant 0 : i32
    %c0_i32_0 = arith.constant 0 : i32
    %c0_i32_1 = arith.constant 0 : i32
    %c0_i32_2 = arith.constant 0 : i32
    return %arg0, %c0_i32, %c0_i32_0, %c0_i32_1 : i32, i32, i32, i32
  }
  func.func @transform_5(%arg0: i32) -> (i32, i32, i32) {
    %c0_i32 = arith.constant 0 : i32
    %c0_i32_0 = arith.constant 0 : i32
    %c0_i32_1 = arith.constant 0 : i32
    return %arg0, %c0_i32, %c0_i32_0 : i32, i32, i32
  }
}

</mosaic_0001>

<bundles_post_ra>
// kernel: unet_innermost_forward.1
= control target key start
LH: loop header
LB: loop body
LE: loop exit
PB: predicated region body
PF: predicated region fallthrough
CT: control target
= control target key end

     0   :  { %s5360_s18 = smov 0   ;;  %s6920_s0 = inlined_call_operand.vmem [shape: f32[2,81,16], index: 0, kind: input, shape index: {}]   ;;  %s6921_s1 = inlined_call_operand.vmem [shape: f32[81,1], index: 1, kind: input, shape index: {}]   ;;  %s6922_s2 = inlined_call_operand.vmem [shape: f32[4,16,8], index: 2, kind: input, shape index: {}]   ;;  %s6923_s3 = inlined_call_operand.vmem [shape: f32[16,8,4], index: 3, kind: input, shape index: {}]   ;;  %s6924_s4 = inlined_call_operand.vmem [shape: f32[2,4,81,4], index: 4, kind: output, shape index: {0}]   ;;  %s6925_s5 = inlined_call_operand.vmem [shape: f32[2,2,4], index: 5, kind: output, shape index: {1}]  }
   0x1 LB: > { %s3724_s19 = sadd.s32 4294967295, %s5324_s18   ;;  %p3728_p0 = scmp.ge.s32.totalorder %s5324_s18, 1  ;;  %s5324_s18 = sphi %s5360_s18, %s16_s18  }
   0x2   : > { %p190_p1 = scmp.lt.s32.totalorder %s5324_s18, 3 }
   0x4   : > { %p191_p2 = pnand %p3728_p0, %p190_p1 }
   0x5   : > { %v3732_v0 = vld [vmem:[%s6922_s2 + $0x10] sm:$0xff] (!%p191_p2)  ;;  %v3733_v1 = vld [vmem:[%s6922_s2 + $0x18] sm:$0xff] (!%p191_p2)  ;;  %p222_p3 = scmp.lt.s32.totalorder (!%p191_p2), %s3724_s19, 1  ;;  %v5326_v2 = vmov (!%p191_p2), 0.0|0.0   ;;  %vm5327_vm0 = vmmov (!%p191_p2), 0   ;;  %v5328_v4 = vmov (!%p191_p2), 0.0  }
   0x6   : > { %194 = sbr.rel (%p191_p2) target bundleno = 1092 (0x444), region = 36  ;;  %4960 = vmatprep.subr.bf16.mxu0 (!%p191_p2), %v5326_v2  ;;  %v4961_v3 = vpack.c.bf16 (!%p191_p2), %v3733_v1, %v3732_v0  ;;  %4256 = vmatprep.mubr.msk.f32.mxu0 (!%p191_p2), %vm5327_vm0, %v5328_v4  ;;  %v291_v5 = vld [vmem:[%s6922_s2] sm:$0xff] (!%p191_p2)  ;;  %v292_v6 = vld [vmem:[%s6922_s2 + $0x8] sm:$0xff] (!%p191_p2)  ;;  %vm304_vm1 = vcmask (!%p191_p2), 1046528   ;;  %vm329_vm4 = vcmask (!%p191_p2), 130048   ;;  %vm746_vm10 = vcmask (!%p191_p2), 1045504  }
   0x7   : > { %4470 = vmatprep.subr.mxu1 (!%p191_p2), %v5328_v4  ;;  %4472 = vmatprep.mubr.msk.f32.mxu1 (!%p191_p2), %vm5327_vm0, %v5328_v4  ;;  %v4964_v20 = vpack.c.bf16 (!%p191_p2), %v292_v6, %v291_v5  ;;  %vm1001_vm15 = vcmask (!%p191_p2), 64512  }
   0x8   : > { %4962 = vmatpush3.bf16.msra.mxu0 (!%p191_p2), %v4961_v3 }
   0x9   : > { %4963 = vmatprep.subr.bf16.mxu0 (!%p191_p2), %v5326_v2 }
   0xd   : > { %s6927_s19 = smov (!%p222_p3, %s3724_s19), 1 }
   0xe   : > { %s5291_s24 = smul.u32 88, %s6927_s19  ;;  %s3731_s29 = sshll.u32 %s6927_s19, 1 }
   0xf   : > { %s5292_s17 = smul.u32 352, %s6927_s19  ;;  %s235_s7 = scalar_lea.vmem %s6925_s5, %s3731_s29 }
  0x10   : > { %s5387_s27 = scalar_lea.vmem %s6920_s0, %s5291_s24 }
  0x11   : > { %v247_v7 = vld [vmem:[%s5387_s27] sm:$0xff]  ;;  %v248_v8 = vld [vmem:[%s5387_s27 + $0x8] sm:$0xff]  ;;  %v249_v9 = vld [vmem:[%s5387_s27 + $0x10] sm:$0xff]  ;;  %s6483_s22 = scalar_lea.vmem %s6924_s4, %s5292_s17 }
  0x12   : > { %vm258_vm2 = vcmp.ge.f32.partialorder %v247_v7, 0.0  ;;  %vm259_vm3 = vcmp.ge.f32.partialorder %v248_v8, 0.0  ;;  %v269_v10 = vmul.f32 0.2, %v247_v7  ;;  %v270_v11 = vmul.f32 0.2, %v248_v8 }
  0x13   : > { %vm260_vm5 = vcmp.ge.f32.partialorder %v249_v9, 0.0  ;;  %v271_v12 = vmul.f32 0.2, %v249_v9  ;;  %v250_v13 = vld [vmem:[%s5387_s27 + $0x18] sm:$0xff]  ;;  %v251_v14 = vld [vmem:[%s5387_s27 + $0x20] sm:$0xff]  ;;  %v252_v26 = vld [vmem:[%s5387_s27 + $0x28] sm:$0xff] }
  0x14   : > { %v5400_v15 = vsel %vm258_vm2, %v247_v7, %v269_v10  ;;  %v5402_v16 = vsel %vm259_vm3, %v248_v8, %v270_v11  ;;  %vm261_vm6 = vcmp.ge.f32.partialorder %v250_v13, 0.0  ;;  %v272_v17 = vmul.f32 0.2, %v250_v13  ;;  %v253_v31 = vld [vmem:[%s5387_s27 + $0x30] sm:$0xff]  ;;  %v254_v37 = vld [vmem:[%s5387_s27 + $0x38] sm:$0xff]  ;;  %v255_v45 = vld [vmem:[%s5387_s27 + $0x40] sm:$0xff] }
  0x15   : > { %v305_v18 = vrot.slane %v5400_v15, 1  ;;  %v5406_v19 = vrot.slane %v5402_v16, 1  ;;  %v5408_v21 = vsel %vm260_vm5, %v249_v9, %v271_v12  ;;  %v273_v24 = vmul.f32 0.2, %v251_v14  ;;  %v256_v52 = vld [vmem:[%s5387_s27 + $0x48] sm:$0xff]  ;;  %v3756_v7 = vld [vmem:[%s6922_s2 + $0x20] sm:$0xff] }
  0x16   : > { %v308_v22 = vrot.slane %v5408_v21, 1  ;;  %v5411_v23 = vsel %vm261_vm6, %v250_v13, %v272_v17  ;;  %vm262_vm7 = vcmp.ge.f32.partialorder %v251_v14, 0.0  ;;  %v274_v30 = vmul.f32 0.2, %v252_v26  ;;  %v257_v58 = vld [vmem:[%s5387_s27 + $0x50] sm:$0x1] }
  0x17   : > { %v5417_v25 = vsel %vm304_vm1, %v305_v18, %v5406_v19  ;;  %v310_v28 = vrot.slane %v5411_v23, 1  ;;  %v5429_v29 = vsel %vm262_vm7, %v251_v14, %v273_v24  ;;  %vm263_vm8 = vcmp.ge.f32.partialorder %v252_v26, 0.0  ;;  %v3757_v8 = vld [vmem:[%s6922_s2 + $0x28] sm:$0xff]  ;;  %v236_v10 = vld [vmem:[%s6921_s1] sm:$0xff]  ;;  %v246_v13 = vld [vmem:[%s6921_s1 + $0x50] sm:$0x1] }
  0x18   : > { %4257 = vmatmul.mubr.msk.f32.vlgmr.msra.gmra.mrb[0].mxu0 %vm329_vm4, %v5417_v25  ;;  %v5426_v27 = vsel %vm304_vm1, %v5406_v19, %v308_v22  ;;  %v312_v33 = vrot.slane %v5429_v29, 1  ;;  %v5441_v34 = vsel %vm263_vm8, %v252_v26, %v274_v30  ;;  %v275_v35 = vmul.f32 0.2, %v253_v31  ;;  %v237_v11 = vld [vmem:[%s6921_s1 + $0x8] sm:$0xff]  ;;  %v238_v14 = vld [vmem:[%s6921_s1 + $0x10] sm:$0xff]  ;;  %v240_v17 = vld [vmem:[%s6921_s1 + $0x20] sm:$0xff] }
  0x19   : > { %4965 = vmatpush3.bf16.msra.mxu0 %v4964_v20  ;;  %4259 = vmatprep.mubr.msk.f32.mxu0 %vm5327_vm0, %v5328_v4  ;;  %v5438_v32 = vsel %vm304_vm1, %v308_v22, %v310_v28  ;;  %v748_v36 = vrot.slane %v5408_v21, 2  ;;  %vm264_vm9 = vcmp.ge.f32.partialorder %v253_v31, 0.0  ;;  %v750_v38 = vrot.slane %v5411_v23, 2  ;;  %v241_v20 = vld [vmem:[%s6921_s1 + $0x28] sm:$0xff]  ;;  %v242_v22 = vld [vmem:[%s6921_s1 + $0x30] sm:$0xff]  ;;  %v244_v24 = vld [vmem:[%s6921_s1 + $0x40] sm:$0xff] }
  0x1a   : > { %4966 = vmatprep.subr.bf16.mxu0 %v5326_v2  ;;  %v5451_v39 = vsel %vm304_vm1, %v310_v28, %v312_v33  ;;  %v314_v40 = vrot.slane %v5441_v34, 1  ;;  %v752_v42 = vrot.slane %v5429_v29, 2  ;;  %v5460_v43 = vsel %vm264_vm9, %v253_v31, %v275_v35  ;;  %v245_v26 = vld [vmem:[%s6921_s1 + $0x48] sm:$0xff]  ;;  %v3769_v28 = vld [vmem:[%s6922_s2 + $0x30] sm:$0xff] }
  0x1b   : > { %v5457_v41 = vsel %vm746_vm10, %v748_v36, %v750_v38  ;;  %v276_v44 = vmul.f32 0.2, %v254_v37  ;;  %vm265_vm11 = vcmp.ge.f32.partialorder %v254_v37, 0.0  ;;  %v316_v48 = vrot.slane %v5460_v43, 1 }
  0x1c   : > { %4260 = vmatmul.mubr.msk.f32.gmra.mrb[2].mxu0 %vm329_vm4, %v5426_v27  ;;  %v5464_v46 = vsel %vm746_vm10, %v750_v38, %v752_v42  ;;  %v5471_v47 = vsel %vm304_vm1, %v312_v33, %v314_v40  ;;  %v754_v49 = vrot.slane %v5441_v34, 2  ;;  %v277_v51 = vmul.f32 0.2, %v255_v45 }
  0x1d   : > { %4262 = vmatprep.mubr.msk.f32.mxu0 %vm5327_vm0, %v5328_v4  ;;  %v5475_v50 = vsel %vm265_vm11, %v254_v37, %v276_v44  ;;  %vm266_vm12 = vcmp.ge.f32.partialorder %v255_v45, 0.0  ;;  %v5488_v54 = vsel %vm304_vm1, %v314_v40, %v316_v48  ;;  %v278_v57 = vmul.f32 0.2, %v256_v52 }
  0x1e   : > { %v5481_v53 = vsel %vm746_vm10, %v752_v42, %v754_v49  ;;  %v318_v55 = vrot.slane %v5475_v50, 1  ;;  %v5491_v56 = vsel %vm266_vm12, %v255_v45, %v277_v51  ;;  %vm267_vm13 = vcmp.ge.f32.partialorder %v256_v52, 0.0 }
  0x1f   : > { %v320_v60 = vrot.slane %v5491_v56, 1  ;;  %v5502_v61 = vsel %vm267_vm13, %v256_v52, %v278_v57  ;;  %v279_v62 = vmul.f32 0.2, %v257_v58  ;;  %vm268_vm14 = vcmp.ge.f32.partialorder %v257_v58, 0.0 }
  0x20   : > { %4263 = vmatmul.mubr.msk.f32.gmra.mrb[4].mxu0 %vm329_vm4, %v5438_v32  ;;  %v5499_v59 = vsel %vm304_vm1, %v316_v48, %v318_v55  ;;  %v322_v0 = vrot.slane %v5502_v61, 1  ;;  %v4967_v9 = vpack.c.bf16 %v3757_v8, %v3756_v7  ;;  %v5329_v12 = vmov 0  }
  0x21   : > { %4265 = vmatprep.mubr.msk.f32.mxu0 %vm5327_vm0, %v5328_v4  ;;  %v5509_v63 = vsel %vm304_vm1, %v318_v55, %v320_v60  ;;  %v5512_v1 = vsel %vm268_vm14, %v257_v58, %v279_v62  ;;  %5305 = vset.pattern.permute.xlu0 %v5329_v12  ;;  %v760_v35 = vrot.slane %v5491_v56, 2  ;;  %vm1012_vm2 = vcmask 57344  }
  0x22   : > { %v5519_v3 = vsel %vm304_vm1, %v320_v60, %v322_v0  ;;  %v324_v5 = vrot.slane %v5512_v1, 1  ;;  %937 = vperm.xlu0 %5305, %v236_v10   ;;  %5306 = vset.pattern.permute.xlu1 %v5329_v12  ;;  %v764_v37 = vrot.slane %v5512_v1, 2  ;;  %vm1028_vm3 = vcmask 1040384  }
  0x23   : > { %942 = vperm.xlu1 %5306, %v237_v11   ;;  %vm1712_vm5 = vcmask 31744   ;;  %vm1723_vm6 = vcmask 24576  }
  0x24   : > { %4266 = vmatmul.mubr.msk.f32.gmra.mrb[6].mxu0 %vm329_vm4, %v5451_v39  ;;  %v5527_v6 = vsel %vm304_vm1, %v322_v0, %v324_v5 }
  0x25   : > { %4268 = vmatprep.mubr.msk.f32.mxu0 %vm5327_vm0, %v5328_v4 }
  0x26   : > { %987 = vperm.xlu0 %5305, %v246_v13  }
  0x27   : > { %947 = vperm.xlu1 %5306, %v238_v14  }
  0x28   : > { %4269 = vmatmul.mubr.msk.f32.gmra.mrb[8].mxu0 %vm329_vm4, %v5471_v47 }
  0x29   : > { %4271 = vmatprep.mubr.msk.f32.mxu0 %vm5327_vm0, %v5328_v4 }
  0x2b   : > { %957 = vperm.xlu1 %5306, %v240_v17  }
  0x2c   : > { %4272 = vmatmul.mubr.msk.f32.gmra.mrb[10].mxu0 %vm329_vm4, %v5488_v54 }
  0x2d   : > { %4274 = vmatprep.mubr.msk.f32.mxu0 %vm5327_vm0, %v5328_v4 }
  0x2f   : > { %967 = vperm.xlu1 %5306, %v242_v22  }
  0x30   : > { %4275 = vmatmul.mubr.msk.f32.gmra.mrb[12].mxu0 %vm329_vm4, %v5499_v59 }
  0x31   : > { %4277 = vmatprep.mubr.msk.f32.mxu0 %vm5327_vm0, %v5328_v4 }
  0x33   : > { %977 = vperm.xlu1 %5306, %v244_v24  }
  0x34   : > { %4278 = vmatmul.mubr.msk.f32.gmra.mrb[14].mxu0 %vm329_vm4, %v5509_v63 }
  0x35   : > { %4280 = vmatprep.mubr.msk.f32.mxu0 %vm5327_vm0, %v5328_v4 }
  0x38   : > { %4281 = vmatmul.mubr.msk.f32.gmra.mrb[16].mxu0 %vm329_vm4, %v5519_v3 }
  0x39   : > { %4283 = vmatprep.mubr.msk.f32.mxu0 %vm5327_vm0, %v5328_v4 }
  0x3c   : > { %4284 = vmatmul.mubr.msk.f32.gmra.mrb[18].mxu0 %vm329_vm4, %v5527_v6 }
  0x3d   : > { %4286 = vmatprep.mubr.msk.f32.mxu0 %vm5327_vm0, %v5328_v4 }
  0x40   : > { %4287 = vmatmul.mubr.msk.f32.gmra.mrb[20].mxu0 %vm329_vm4, %v5400_v15 }
  0x41   : > { %4293 = vmatprep.mubr.msk.f32.mxu0 %vm5327_vm0, %v5328_v4 }
  0x44   : > { %4294 = vmatmul.mubr.msk.f32.vlgmr.msra.gmra.mrb[0].mxu0 %vm329_vm4, %v5400_v15 }
  0x45   : > { %4968 = vmatpush3.bf16.msra.mxu0 %v4967_v9  ;;  %4296 = vmatprep.mubr.msk.f32.mxu0 %vm5327_vm0, %v5328_v4 }
  0x46   : > { %4969 = vmatprep.subr.bf16.mxu0 %v5326_v2  ;;  %v239_v2 = vld [vmem:[%s6921_s1 + $0x18] sm:$0xff] }
  0x47   : > { %952 = vperm.xlu0 %5305, %v239_v2  }
  0x48   : > { %4297 = vmatmul.mubr.msk.f32.gmra.mrb[2].mxu0 %vm329_vm4, %v5402_v16 }
  0x49   : > { %4299 = vmatprep.mubr.msk.f32.mxu0 %vm5327_vm0, %v5328_v4 }
  0x4b   : > { %962 = vperm.xlu0 %5305, %v241_v20  }
  0x4c   : > { %4300 = vmatmul.mubr.msk.f32.gmra.mrb[4].mxu0 %vm329_vm4, %v5408_v21 }
  0x4d   : > { %4302 = vmatprep.mubr.msk.f32.mxu0 %vm5327_vm0, %v5328_v4 }
  0x50   : > { %4303 = vmatmul.mubr.msk.f32.gmra.mrb[6].mxu0 %vm329_vm4, %v5411_v23  ;;  %v243_v23 = vld [vmem:[%s6921_s1 + $0x38] sm:$0xff] }
  0x51   : > { %4305 = vmatprep.mubr.msk.f32.mxu0 %vm5327_vm0, %v5328_v4  ;;  %972 = vperm.xlu0 %5305, %v243_v23  }
  0x54   : > { %4306 = vmatmul.mubr.msk.f32.gmra.mrb[8].mxu0 %vm329_vm4, %v5429_v29  ;;  %v3770_v29 = vld [vmem:[%s6922_s2 + $0x38] sm:$0xff] }
  0x55   : > { %4308 = vmatprep.mubr.msk.f32.mxu0 %vm5327_vm0, %v5328_v4  ;;  %982 = vperm.xlu0 %5305, %v245_v26   ;;  %v4970_v30 = vpack.c.bf16 %v3770_v29, %v3769_v28 }
  0x58   : > { %4309 = vmatmul.mubr.msk.f32.gmra.mrb[10].mxu0 %vm329_vm4, %v5441_v34 }
  0x59   : > { %4311 = vmatprep.mubr.msk.f32.mxu0 %vm5327_vm0, %v5328_v4 }
  0x5c   : > { %4312 = vmatmul.mubr.msk.f32.gmra.mrb[12].mxu0 %vm329_vm4, %v5460_v43 }
  0x5d   : > { %4314 = vmatprep.mubr.msk.f32.mxu0 %vm5327_vm0, %v5328_v4 }
  0x60   : > { %4315 = vmatmul.mubr.msk.f32.gmra.mrb[14].mxu0 %vm329_vm4, %v5475_v50 }
  0x61   : > { %4317 = vmatprep.mubr.msk.f32.mxu0 %vm5327_vm0, %v5328_v4 }
  0x64   : > { %4318 = vmatmul.mubr.msk.f32.gmra.mrb[16].mxu0 %vm329_vm4, %v5491_v56 }
  0x65   : > { %4320 = vmatprep.mubr.msk.f32.mxu0 %vm5327_vm0, %v5328_v4 }
  0x68   : > { %4321 = vmatmul.mubr.msk.f32.gmra.mrb[18].mxu0 %vm329_vm4, %v5502_v61 }
  0x69   : > { %4323 = vmatprep.mubr.msk.f32.mxu0 %vm5327_vm0, %v5328_v4 }
  0x6c   : > { %4324 = vmatmul.mubr.msk.f32.gmra.mrb[20].mxu0 %vm329_vm4, %v5512_v1 }
  0x6d   : > { %4330 = vmatprep.mubr.msk.f32.mxu0 %vm5327_vm0, %v5328_v4 }
  0x70   : > { %4331 = vmatmul.mubr.msk.f32.vlgmr.msra.gmra.mrb[0].mxu0 %vm329_vm4, %v5426_v27  ;;  %v747_v27 = vrot.slane %v5402_v16, 2 }
  0x71   : > { %4971 = vmatpush3.bf16.msra.mxu0 %v4970_v30  ;;  %4333 = vmatprep.mubr.msk.f32.mxu0 %vm5327_vm0, %v5328_v4 }
  0x72   : > { %4400 = vmatprep.subr.mxu0 %v5328_v4  ;;  %v749_v31 = vsel %vm746_vm10, %v747_v27, %v748_v36  ;;  %v762_v36 = vrot.slane %v5502_v61, 2 }
  0x74   : > { %4334 = vmatmul.mubr.msk.f32.gmra.mrb[2].mxu0 %vm329_vm4, %v5438_v32  ;;  %v758_v32 = vrot.slane %v5475_v50, 2  ;;  %v763_v38 = vsel %vm746_vm10, %v760_v35, %v762_v36 }
  0x75   : > { %4336 = vmatprep.mubr.msk.f32.mxu0 %vm5327_vm0, %v5328_v4 }
  0x76   : > { %v761_v34 = vsel %vm746_vm10, %v758_v32, %v760_v35 }
  0x78   : > { %4337 = vmatmul.mubr.msk.f32.gmra.mrb[4].mxu0 %vm329_vm4, %v5451_v39  ;;  %v765_v39 = vsel %vm746_vm10, %v762_v36, %v764_v37 }
  0x79   : > { %4339 = vmatprep.mubr.msk.f32.mxu0 %vm5327_vm0, %v5328_v4  ;;  %v768_v40 = vsel %vm304_vm1, %v765_v39, %v305_v18  ;;  %v3805_v18 = vld [vmem:[%s6923_s3 + $0x10] sm:$0xff] }
  0x7a   : > { %4471 = vmatpush3.msra.mxu1 %v3805_v18 }
  0x7b   : > { %4505 = vmatprep.subr.mxu1 %v5328_v4 }
  0x7c   : > { %4340 = vmatmul.mubr.msk.f32.gmra.mrb[6].mxu0 %vm329_vm4, %v5471_v47 }
  0x7d   : > { %4342 = vmatprep.mubr.msk.f32.mxu0 %vm5327_vm0, %v5328_v4 }
  0x80   : > { %4343 = vmatmul.mubr.msk.f32.gmra.mrb[8].mxu0 %vm329_vm4, %v5488_v54 }
  0x81   : > { %4345 = vmatprep.mubr.msk.f32.mxu0 %vm5327_vm0, %v5328_v4 }
  0x84   : > { %4346 = vmatmul.mubr.msk.f32.gmra.mrb[10].mxu0 %vm329_vm4, %v5499_v59 }
  0x85   : > { %4348 = vmatprep.mubr.msk.f32.mxu0 %vm5327_vm0, %v5328_v4 }
  0x88   : > { %4349 = vmatmul.mubr.msk.f32.gmra.mrb[12].mxu0 %vm329_vm4, %v5509_v63 }
  0x89   : > { %4351 = vmatprep.mubr.msk.f32.mxu0 %vm5327_vm0, %v5328_v4 }
  0x8c   : > { %4352 = vmatmul.mubr.msk.f32.gmra.mrb[14].mxu0 %vm329_vm4, %v5519_v3 }
  0x8d   : > { %4354 = vmatprep.mubr.msk.f32.mxu0 %vm5327_vm0, %v5328_v4 }
  0x90   : > { %4355 = vmatmul.mubr.msk.f32.gmra.mrb[16].mxu0 %vm329_vm4, %v5527_v6 }
  0x91   : > { %4357 = vmatprep.mubr.msk.f32.mxu0 %vm5327_vm0, %v5328_v4 }
  0x94   : > { %4358 = vmatmul.mubr.msk.f32.gmra.mrb[18].mxu0 %vm329_vm4, %v5400_v15  ;;  %v3782_v15 = vld [vmem:[%s6923_s3 + $0x8] sm:$0xff] }
  0x95   : > { %4360 = vmatprep.mubr.msk.f32.mxu0 %vm5327_vm0, %v5328_v4 }
  0x98   : > { %4361 = vmatmul.mubr.msk.f32.gmra.mrb[20].mxu0 %vm329_vm4, %v5402_v16  ;;  %v756_v16 = vrot.slane %v5460_v43, 2 }
  0x99   : > { %4367 = vmatprep.mubr.msk.f32.mxu0 %vm5327_vm0, %v5328_v4 }
  0x9a   : > { %v757_v21 = vsel %vm746_vm10, %v754_v49, %v756_v16  ;;  %v759_v33 = vsel %vm746_vm10, %v756_v16, %v758_v32 }
  0x9c   : > { %4368 = vmatmul.mubr.msk.f32.vlgmr.msra.gmra.mrb[0].mxu0 %vm329_vm4, %v749_v31 }
  0x9d   : > { %4370 = vmatprep.mubr.msk.f32.mxu0 %vm5327_vm0, %v5328_v4  ;;  %4401 = vmatpush3.msra.mxu0 %v3782_v15  ;;  %v3817_v15 = vld [vmem:[%s6923_s3 + $0x18] sm:$0xff] }
  0x9e   : > { %4435 = vmatprep.subr.mxu0 %v5328_v4 }
  0xa0   : > { %4371 = vmatmul.mubr.msk.f32.gmra.mrb[2].mxu0 %vm329_vm4, %v5457_v41 }
  0xa1   : > { %4373 = vmatprep.mubr.msk.f32.mxu0 %vm5327_vm0, %v5328_v4  ;;  %v5737_v41 = vpop.permute.xlu0 %937 }
  0xa2   : > { %v5739_v43 = vpop.permute.xlu1 %942 }
  0xa4   : > { %4374 = vmatmul.mubr.msk.f32.gmra.mrb[4].mxu0 %vm329_vm4, %v5464_v46 }
  0xa5   : > { %4376 = vmatprep.mubr.msk.f32.mxu0 %vm5327_vm0, %v5328_v4  ;;  %v5743_v48 = vpop.permute.xlu0 %987 }
  0xa6   : > { %v5746_v51 = vpop.permute.xlu1 %947 }
  0xa8   : > { %4377 = vmatmul.mubr.msk.f32.gmra.mrb[6].mxu0 %vm329_vm4, %v5481_v53 }
  0xa9   : > { %4379 = vmatprep.mubr.msk.f32.mxu0 %vm5327_vm0, %v5328_v4 }
  0xaa   : > { %v5754_v61 = vpop.permute.xlu1 %957 }
  0xac   : > { %4380 = vmatmul.mubr.msk.f32.gmra.mrb[8].mxu0 %vm329_vm4, %v757_v21 }
  0xad   : > { %4382 = vmatprep.mubr.msk.f32.mxu0 %vm5327_vm0, %v5328_v4 }
  0xae   : > { %v5762_v9 = vpop.permute.xlu1 %967 }
  0xb0   : > { %4383 = vmatmul.mubr.msk.f32.gmra.mrb[10].mxu0 %vm329_vm4, %v759_v33 }
  0xb1   : > { %4385 = vmatprep.mubr.msk.f32.mxu0 %vm5327_vm0, %v5328_v4 }
  0xb2   : > { %v5770_v23 = vpop.permute.xlu1 %977 }
  0xb4   : > { %4386 = vmatmul.mubr.msk.f32.gmra.mrb[12].mxu0 %vm329_vm4, %v761_v34  ;;  %v1124_v34 = vld [vmem:[%s6923_s3] sm:$0xff] }
  0xb5   : > { %4388 = vmatprep.mubr.msk.f32.mxu0 %vm5327_vm0, %v5328_v4 }
  0xb8   : > { %4389 = vmatmul.mubr.msk.f32.gmra.mrb[14].mxu0 %vm329_vm4, %v763_v38 }
  0xb9   : > { %4391 = vmatprep.mubr.msk.f32.mxu0 %vm5327_vm0, %v5328_v4 }
  0xbc   : > { %4392 = vmatmul.mubr.msk.f32.gmra.mrb[16].mxu0 %vm329_vm4, %v768_v40 }
  0xbd   : > { %4394 = vmatprep.mubr.msk.f32.mxu0 %vm5327_vm0, %v5328_v4 }
  0xc0   : > { %4395 = vmatmul.mubr.msk.f32.gmra.mrb[18].mxu0 %vm329_vm4, %v5417_v25 }
  0xc1   : > { %4397 = vmatprep.mubr.msk.f32.mxu0 %vm5327_vm0, %v5328_v4 }
  0xc4   : > { %4398 = vmatmul.mubr.msk.f32.gmra.mrb[20].mxu0 %vm329_vm4, %v5406_v19  ;;  %vm1043_vm4 = vcmask 1041408  }
  0xc5   : > { %4402 = vmatprep.mubr.msk.f32.mxu0 %vm5327_vm0, %v5328_v4 }
  0xc6   : > { %v5750_v56 = vpop.permute.xlu0 %952 }
  0xca   : > { %v5758_v3 = vpop.permute.xlu0 %962 }
  0xd0   : > { %v5766_v14 = vpop.permute.xlu0 %972 }
  0xd4   : > { %v5774_v30 = vpop.permute.xlu0 %982 }
 0x16f   : > { %v859_v25 = vpop.f32.mrb[0].mxu0 }
 0x170   : > { %v924_v19 = vmax.f32 %v859_v25, 0.0  ;;  %v4369_v42 = vpop.f32.mrb[1].mxu0 }
 0x172   : > { %v990_v44 = vmul.f32 %v5737_v41, %v924_v19 }
 0x173   : > { %v864_v45 = vpop.f32.mrb[2].mxu0 }
 0x174   : > { %1002 = vst.msk [vmem:[#allocation2] sm:$0xff] %vm1001_vm15, %v990_v44  ;;  %v925_v46 = vmax.f32 %v864_v45, 0.0  ;;  %v4372_v47 = vpop.f32.mrb[3].mxu0 }
 0x176   : > { %v991_v49 = vmul.f32 %v5739_v43, %v925_v46 }
 0x177   : > { %v869_v50 = vpop.f32.mrb[4].mxu0 }
 0x178   : > { %1003 = vst.msk [vmem:[#allocation2 + $0x8] sm:$0xff] %vm1001_vm15, %v991_v49  ;;  %v926_v52 = vmax.f32 %v869_v50, 0.0  ;;  %v4375_v53 = vpop.f32.mrb[5].mxu0 }
 0x17a   : > { %v992_v54 = vmul.f32 %v5746_v51, %v926_v52 }
 0x17b   : > { %v874_v55 = vpop.f32.mrb[6].mxu0  ;;  %v5783_v36 = vld [vmem:[#allocation2] sm:$0xff] }
 0x17c   : > { %1004 = vst.msk [vmem:[#allocation2 + $0x10] sm:$0xff] %vm1001_vm15, %v992_v54  ;;  %v927_v57 = vmax.f32 %v874_v55, 0.0  ;;  %v4378_v58 = vpop.f32.mrb[7].mxu0  ;;  %v5794_v39 = vrot.slane %v5783_v36, 7 }
 0x17e   : > { %v993_v59 = vmul.f32 %v5750_v56, %v927_v57 }
 0x17f   : > { %v879_v60 = vpop.f32.mrb[8].mxu0  ;;  %v5789_v38 = vld [vmem:[#allocation2 + $0x8] sm:$0xff] }
 0x180   : > { %1005 = vst.msk [vmem:[#allocation2 + $0x18] sm:$0xff] %vm1001_vm15, %v993_v59  ;;  %v928_v62 = vmax.f32 %v879_v60, 0.0  ;;  %v4381_v63 = vpop.f32.mrb[9].mxu0  ;;  %v1064_v25 = vrot.slane %v5789_v38, 7 }
 0x182   : > { %v994_v0 = vmul.f32 %v5754_v61, %v928_v62  ;;  %v5821_v42 = vsel %vm1028_vm3, %v5794_v39, %v1064_v25 }
 0x183   : > { %v884_v1 = vpop.f32.mrb[10].mxu0  ;;  %v5812_v19 = vld [vmem:[#allocation2 + $0x10] sm:$0xff] }
 0x184   : > { %1006 = vst.msk [vmem:[#allocation2 + $0x20] sm:$0xff] %vm1001_vm15, %v994_v0  ;;  %v929_v5 = vmax.f32 %v884_v1, 0.0  ;;  %v4384_v6 = vpop.f32.mrb[11].mxu0  ;;  %v1066_v44 = vrot.slane %v5812_v19, 7 }
 0x186   : > { %v995_v7 = vmul.f32 %v5758_v3, %v929_v5  ;;  %v5835_v46 = vsel %vm1028_vm3, %v1064_v25, %v1066_v44 }
 0x187   : > { %v889_v8 = vpop.f32.mrb[12].mxu0  ;;  %v5828_v45 = vld [vmem:[#allocation2 + $0x18] sm:$0xff] }
 0x188   : > { %1007 = vst.msk [vmem:[#allocation2 + $0x28] sm:$0xff] %vm1001_vm15, %v995_v7  ;;  %v930_v10 = vmax.f32 %v889_v8, 0.0  ;;  %v4387_v11 = vpop.f32.mrb[13].mxu0  ;;  %v1068_v47 = vrot.slane %v5828_v45, 7 }
 0x189   : > { %v3889_v11 = vld [vmem:[%s6923_s3 + $0x48] sm:$0xff] }
 0x18a   : > { %v996_v12 = vmul.f32 %v5762_v9, %v930_v10  ;;  %v5849_v50 = vsel %vm1028_vm3, %v1066_v44, %v1068_v47 }
 0x18b   : > { %v894_v13 = vpop.f32.mrb[14].mxu0  ;;  %v5842_v49 = vld [vmem:[#allocation2 + $0x20] sm:$0xff] }
 0x18c   : > { %1008 = vst.msk [vmem:[#allocation2 + $0x30] sm:$0xff] %vm1001_vm15, %v996_v12  ;;  %v931_v2 = vmax.f32 %v894_v13, 0.0  ;;  %v4390_v17 = vpop.f32.mrb[15].mxu0  ;;  %v1070_v52 = vrot.slane %v5842_v49, 7  ;;  %v1044_v13 = vrot.slane %v5783_v36, 6 }
 0x18e   : > { %v997_v20 = vmul.f32 %v5766_v14, %v931_v2  ;;  %v5863_v54 = vsel %vm1028_vm3, %v1068_v47, %v1070_v52  ;;  %v3830_v2 = vld [vmem:[%s6923_s3 + $0x28] sm:$0xff]  ;;  %v3888_v47 = vld [vmem:[%s6923_s3 + $0x40] sm:$0xff] }
 0x18f   : > { %v899_v22 = vpop.f32.mrb[16].mxu0  ;;  %v5856_v53 = vld [vmem:[#allocation2 + $0x28] sm:$0xff] }
 0x190   : > { %1009 = vst.msk [vmem:[#allocation2 + $0x38] sm:$0xff] %vm1001_vm15, %v997_v20  ;;  %v932_v24 = vmax.f32 %v899_v22, 0.0  ;;  %v4393_v26 = vpop.f32.mrb[17].mxu0  ;;  %v1072_v55 = vrot.slane %v5856_v53, 7  ;;  %v1045_v20 = vrot.slane %v5789_v38, 6 }
 0x192   : > { %v998_v28 = vmul.f32 %v5770_v23, %v932_v24  ;;  %v5877_v58 = vsel %vm1028_vm3, %v1070_v52, %v1072_v55  ;;  %v1046_v22 = vsel %vm1043_vm4, %v1044_v13, %v1045_v20  ;;  %v1047_v24 = vrot.slane %v5812_v19, 6 }
 0x193   : > { %v904_v29 = vpop.f32.mrb[18].mxu0  ;;  %v5870_v57 = vld [vmem:[#allocation2 + $0x30] sm:$0xff] }
 0x194   : > { %1010 = vst.msk [vmem:[#allocation2 + $0x40] sm:$0xff] %vm1001_vm15, %v998_v28  ;;  %v933_v27 = vmax.f32 %v904_v29, 0.0  ;;  %v4396_v31 = vpop.f32.mrb[19].mxu0  ;;  %v1074_v59 = vrot.slane %v5870_v57, 7  ;;  %v1048_v26 = vsel %vm1043_vm4, %v1045_v20, %v1047_v24  ;;  %v1049_v28 = vrot.slane %v5828_v45, 6 }
 0x196   : > { %v999_v16 = vmul.f32 %v5774_v30, %v933_v27  ;;  %v5891_v62 = vsel %vm1028_vm3, %v1072_v55, %v1074_v59  ;;  %v1050_v29 = vsel %vm1043_vm4, %v1047_v24, %v1049_v28  ;;  %v1051_v27 = vrot.slane %v5842_v49, 6  ;;  %v3829_v55 = vld [vmem:[%s6923_s3 + $0x20] sm:$0xff] }
 0x197   : > { %v909_v21 = vpop.f32.mrb[20].mxu0  ;;  %v5884_v60 = vld [vmem:[#allocation2 + $0x38] sm:$0xff] }
 0x198   : > { %1011 = vst.msk [vmem:[#allocation2 + $0x48] sm:$0xff] %vm1001_vm15, %v999_v16  ;;  %v934_v32 = vmax.f32 %v909_v21, 0.0  ;;  %v4399_v33 = vpop.f32.mrb[21].mxu0  ;;  %v1076_v63 = vrot.slane %v5884_v60, 7  ;;  %v1052_v31 = vsel %vm1043_vm4, %v1049_v28, %v1051_v27  ;;  %v1053_v16 = vrot.slane %v5856_v53, 6 }
 0x19a   : > { %v1000_v35 = vmul.f32 %v5743_v48, %v934_v32  ;;  %v5905_v1 = vsel %vm1028_vm3, %v1074_v59, %v1076_v63  ;;  %v1054_v21 = vsel %vm1043_vm4, %v1051_v27, %v1053_v16  ;;  %v1055_v32 = vrot.slane %v5870_v57, 6 }
 0x19b   : > { %v5898_v0 = vld [vmem:[#allocation2 + $0x40] sm:$0xff] }
 0x19c   : > { %1013 = vst.msk [vmem:[#allocation2 + $0x50] sm:$0x1] %vm1012_vm2, %v1000_v35  ;;  %v5908_v5 = vrot.slane %v5898_v0, 7  ;;  %v1056_v33 = vsel %vm1043_vm4, %v1053_v16, %v1055_v32  ;;  %v1057_v35 = vrot.slane %v5884_v60, 6 }
 0x19e   : > { %v5920_v6 = vsel %vm1028_vm3, %v1076_v63, %v5908_v5  ;;  %v3912_v63 = vld [vmem:[%s6923_s3 + $0x50] sm:$0xff] }
 0x19f   : > { %v5785_v37 = vld [vmem:[#allocation2 + $0x48] sm:$0xff] }
 0x1a0   : > { %4403 = vmatmul.mubr.msk.f32.vlgmr.msra.gmra.mrb[22].mxu0 %vm1001_vm15, %v5785_v37  ;;  %v5923_v7 = vrot.slane %v5785_v37, 7  ;;  %v1081_v52 = vrot.slane %v5785_v37, 1 }
 0x1a1   : > { %4405 = vmatprep.mubr.msk.f32.mxu0 %vm5327_vm0, %v5328_v4  ;;  %4436 = vmatpush3.msra.mxu0 %v1124_v34  ;;  %v1058_v34 = vsel %vm1043_vm4, %v1055_v32, %v1057_v35 }
 0x1a2   : > { %4680 = vmatprep.subr.mxu0 %v5328_v4  ;;  %v5936_v8 = vsel %vm1028_vm3, %v5908_v5, %v5923_v7 }
 0x1a3   : > { %v5797_v40 = vld [vmem:[#allocation2 + $0x50] sm:$0x1] }
 0x1a4   : > { %v5805_v18 = vsel %vm1028_vm3, %v5797_v40, %v5794_v39  ;;  %v1032_v10 = vrot.slane %v5797_v40, 7  ;;  %v1082_v44 = vrot.slane %v5797_v40, 1 }
 0x1a5   : > { %4406 = vmatmul.mubr.msk.f32.gmra.mrb[24].mxu0 %vm1001_vm15, %v5805_v18  ;;  %4473 = vmatmul.mubr.msk.f32.vlgmr.msra.gmra.mrb[0].mxu1 %vm1001_vm15, %v5805_v18 }
 0x1a6   : > { %4506 = vmatpush3.msra.mxu1 %v3817_v15  ;;  %4408 = vmatprep.mubr.msk.f32.mxu0 %vm5327_vm0, %v5328_v4  ;;  %v1033_v12 = vsel %vm1028_vm3, %v5923_v7, %v1032_v10  ;;  %v1059_v15 = vrot.slane %v5898_v0, 6  ;;  %v6072_v59 = vsel %vm304_vm1, %v1081_v52, %v1082_v44  ;;  %v3853_v10 = vld [vmem:[%s6923_s3 + $0x30] sm:$0xff] }
 0x1a7   : > { %4475 = vmatprep.mubr.msk.f32.mxu1 %vm5327_vm0, %v5328_v4  ;;  %4540 = vmatprep.subr.mxu1 %v5328_v4  ;;  %v1062_v17 = vsel %vm1043_vm4, %v1033_v12, %v1044_v13  ;;  %v1099_v13 = vrot.slane %v5898_v0, 1 }
 0x1a8   : > { %v1060_v25 = vsel %vm1043_vm4, %v1057_v35, %v1059_v15 }
 0x1a9   : > { %4409 = vmatmul.mubr.msk.f32.gmra.mrb[26].mxu0 %vm1001_vm15, %v5821_v42  ;;  %4476 = vmatmul.mubr.msk.f32.gmra.mrb[2].mxu1 %vm1001_vm15, %v5821_v42 }
 0x1aa   : > { %4411 = vmatprep.mubr.msk.f32.mxu0 %vm5327_vm0, %v5328_v4  ;;  %4478 = vmatprep.mubr.msk.f32.mxu1 %vm5327_vm0, %v5328_v4 }
 0x1ad   : > { %4412 = vmatmul.mubr.msk.f32.gmra.mrb[28].mxu0 %vm1001_vm15, %v5835_v46  ;;  %4479 = vmatmul.mubr.msk.f32.gmra.mrb[4].mxu1 %vm1001_vm15, %v5835_v46 }
 0x1ae   : > { %4414 = vmatprep.mubr.msk.f32.mxu0 %vm5327_vm0, %v5328_v4  ;;  %4481 = vmatprep.mubr.msk.f32.mxu1 %vm5327_vm0, %v5328_v4 }
 0x1b1   : > { %4415 = vmatmul.mubr.msk.f32.gmra.mrb[30].mxu0 %vm1001_vm15, %v5849_v50  ;;  %4482 = vmatmul.mubr.msk.f32.gmra.mrb[6].mxu1 %vm1001_vm15, %v5849_v50 }
 0x1b2   : > { %4417 = vmatprep.mubr.msk.f32.mxu0 %vm5327_vm0, %v5328_v4  ;;  %4484 = vmatprep.mubr.msk.f32.mxu1 %vm5327_vm0, %v5328_v4 }
 0x1b5   : > { %4418 = vmatmul.mubr.msk.f32.gmra.mrb[32].mxu0 %vm1001_vm15, %v5863_v54  ;;  %4485 = vmatmul.mubr.msk.f32.gmra.mrb[8].mxu1 %vm1001_vm15, %v5863_v54 }
 0x1b6   : > { %4420 = vmatprep.mubr.msk.f32.mxu0 %vm5327_vm0, %v5328_v4  ;;  %4487 = vmatprep.mubr.msk.f32.mxu1 %vm5327_vm0, %v5328_v4 }
 0x1b9   : > { %4421 = vmatmul.mubr.msk.f32.gmra.mrb[34].mxu0 %vm1001_vm15, %v5877_v58  ;;  %4488 = vmatmul.mubr.msk.f32.gmra.mrb[10].mxu1 %vm1001_vm15, %v5877_v58 }
 0x1ba   : > { %4423 = vmatprep.mubr.msk.f32.mxu0 %vm5327_vm0, %v5328_v4  ;;  %4490 = vmatprep.mubr.msk.f32.mxu1 %vm5327_vm0, %v5328_v4 }
 0x1bd   : > { %4424 = vmatmul.mubr.msk.f32.gmra.mrb[36].mxu0 %vm1001_vm15, %v5891_v62  ;;  %4491 = vmatmul.mubr.msk.f32.gmra.mrb[12].mxu1 %vm1001_vm15, %v5891_v62 }
 0x1be   : > { %4426 = vmatprep.mubr.msk.f32.mxu0 %vm5327_vm0, %v5328_v4  ;;  %4493 = vmatprep.mubr.msk.f32.mxu1 %vm5327_vm0, %v5328_v4 }
 0x1c1   : > { %4427 = vmatmul.mubr.msk.f32.gmra.mrb[38].mxu0 %vm1001_vm15, %v5905_v1  ;;  %4494 = vmatmul.mubr.msk.f32.gmra.mrb[14].mxu1 %vm1001_vm15, %v5905_v1 }
 0x1c2   : > { %4429 = vmatprep.mubr.msk.f32.mxu0 %vm5327_vm0, %v5328_v4  ;;  %4496 = vmatprep.mubr.msk.f32.mxu1 %vm5327_vm0, %v5328_v4 }
 0x1c5   : > { %4430 = vmatmul.mubr.msk.f32.gmra.mrb[40].mxu0 %vm1001_vm15, %v5920_v6  ;;  %4497 = vmatmul.mubr.msk.f32.gmra.mrb[16].mxu1 %vm1001_vm15, %v5920_v6 }
 0x1c6   : > { %4432 = vmatprep.mubr.msk.f32.mxu0 %vm5327_vm0, %v5328_v4  ;;  %4499 = vmatprep.mubr.msk.f32.mxu1 %vm5327_vm0, %v5328_v4 }
 0x1c9   : > { %4433 = vmatmul.mubr.msk.f32.gmra.mrb[42].mxu0 %vm1001_vm15, %v5908_v5  ;;  %4500 = vmatmul.mubr.msk.f32.gmra.mrb[18].mxu1 %vm1001_vm15, %v5936_v8 }
 0x1ca   : > { %4437 = vmatprep.mubr.msk.f32.mxu0 %vm5327_vm0, %v5328_v4  ;;  %4502 = vmatprep.mubr.msk.f32.mxu1 %vm5327_vm0, %v5328_v4 }
 0x1cd   : > { %4438 = vmatmul.mubr.msk.f32.vlgmr.msra.gmra.mrb[22].mxu0 %vm1001_vm15, %v5936_v8  ;;  %4503 = vmatmul.mubr.msk.f32.gmra.mrb[20].mxu1 %vm1001_vm15, %v5923_v7 }
 0x1ce   : > { %4440 = vmatprep.mubr.msk.f32.mxu0 %vm5327_vm0, %v5328_v4  ;;  %4507 = vmatprep.mubr.msk.f32.mxu1 %vm5327_vm0, %v5328_v4 }
 0x1cf   : > { %4681 = vmatpush3.msra.mxu0 %v3889_v11  ;;  %v1097_v11 = vrot.slane %v5884_v60, 1 }
 0x1d0   : > { %4715 = vmatprep.subr.mxu0 %v5328_v4 }
 0x1d1   : > { %4441 = vmatmul.mubr.msk.f32.gmra.mrb[24].mxu0 %vm1001_vm15, %v1062_v17  ;;  %4508 = vmatmul.mubr.msk.f32.vlgmr.msra.gmra.mrb[0].mxu1 %vm1001_vm15, %v5783_v36  ;;  %v6449_v17 = vsel %vm304_vm1, %v1099_v13, %v1081_v52 }
 0x1d2   : > { %4541 = vmatpush3.msra.mxu1 %v3830_v2  ;;  %4443 = vmatprep.mubr.msk.f32.mxu0 %vm5327_vm0, %v5328_v4  ;;  %v6436_v2 = vsel %vm304_vm1, %v1097_v11, %v1099_v13 }
 0x1d3   : > { %4510 = vmatprep.mubr.msk.f32.mxu1 %vm5327_vm0, %v5328_v4  ;;  %4575 = vmatprep.subr.mxu1 %v5328_v4 }
 0x1d5   : > { %4444 = vmatmul.mubr.msk.f32.gmra.mrb[26].mxu0 %vm1001_vm15, %v1046_v22  ;;  %4511 = vmatmul.mubr.msk.f32.gmra.mrb[2].mxu1 %vm1001_vm15, %v5789_v38 }
 0x1d6   : > { %4446 = vmatprep.mubr.msk.f32.mxu0 %vm5327_vm0, %v5328_v4  ;;  %4513 = vmatprep.mubr.msk.f32.mxu1 %vm5327_vm0, %v5328_v4 }
 0x1d9   : > { %4447 = vmatmul.mubr.msk.f32.gmra.mrb[28].mxu0 %vm1001_vm15, %v1048_v26  ;;  %4514 = vmatmul.mubr.msk.f32.gmra.mrb[4].mxu1 %vm1001_vm15, %v5812_v19 }
 0x1da   : > { %4449 = vmatprep.mubr.msk.f32.mxu0 %vm5327_vm0, %v5328_v4  ;;  %4516 = vmatprep.mubr.msk.f32.mxu1 %vm5327_vm0, %v5328_v4 }
 0x1dd   : > { %4450 = vmatmul.mubr.msk.f32.gmra.mrb[30].mxu0 %vm1001_vm15, %v1050_v29  ;;  %4517 = vmatmul.mubr.msk.f32.gmra.mrb[6].mxu1 %vm1001_vm15, %v5828_v45 }
 0x1de   : > { %4452 = vmatprep.mubr.msk.f32.mxu0 %vm5327_vm0, %v5328_v4  ;;  %4519 = vmatprep.mubr.msk.f32.mxu1 %vm5327_vm0, %v5328_v4 }
 0x1e1   : > { %4453 = vmatmul.mubr.msk.f32.gmra.mrb[32].mxu0 %vm1001_vm15, %v1052_v31  ;;  %4520 = vmatmul.mubr.msk.f32.gmra.mrb[8].mxu1 %vm1001_vm15, %v5842_v49 }
 0x1e2   : > { %4455 = vmatprep.mubr.msk.f32.mxu0 %vm5327_vm0, %v5328_v4  ;;  %4522 = vmatprep.mubr.msk.f32.mxu1 %vm5327_vm0, %v5328_v4 }
 0x1e5   : > { %4456 = vmatmul.mubr.msk.f32.gmra.mrb[34].mxu0 %vm1001_vm15, %v1054_v21  ;;  %4523 = vmatmul.mubr.msk.f32.gmra.mrb[10].mxu1 %vm1001_vm15, %v5856_v53 }
 0x1e6   : > { %4458 = vmatprep.mubr.msk.f32.mxu0 %vm5327_vm0, %v5328_v4  ;;  %4525 = vmatprep.mubr.msk.f32.mxu1 %vm5327_vm0, %v5328_v4 }
 0x1e9   : > { %4459 = vmatmul.mubr.msk.f32.gmra.mrb[36].mxu0 %vm1001_vm15, %v1056_v33  ;;  %4526 = vmatmul.mubr.msk.f32.gmra.mrb[12].mxu1 %vm1001_vm15, %v5870_v57 }
 0x1ea   : > { %4461 = vmatprep.mubr.msk.f32.mxu0 %vm5327_vm0, %v5328_v4  ;;  %4528 = vmatprep.mubr.msk.f32.mxu1 %vm5327_vm0, %v5328_v4 }
 0x1ed   : > { %4462 = vmatmul.mubr.msk.f32.gmra.mrb[38].mxu0 %vm1001_vm15, %v1058_v34  ;;  %4529 = vmatmul.mubr.msk.f32.gmra.mrb[14].mxu1 %vm1001_vm15, %v5884_v60  ;;  %v3947_v34 = vld [vmem:[%s6923_s3 + $0x60] sm:$0xff] }
 0x1ee   : > { %4464 = vmatprep.mubr.msk.f32.mxu0 %vm5327_vm0, %v5328_v4  ;;  %4531 = vmatprep.mubr.msk.f32.mxu1 %vm5327_vm0, %v5328_v4 }
 0x1f1   : > { %4465 = vmatmul.mubr.msk.f32.gmra.mrb[40].mxu0 %vm1001_vm15, %v1060_v25  ;;  %4532 = vmatmul.mubr.msk.f32.gmra.mrb[16].mxu1 %vm1001_vm15, %v5898_v0 }
 0x1f2   : > { %4467 = vmatprep.mubr.msk.f32.mxu0 %vm5327_vm0, %v5328_v4  ;;  %4534 = vmatprep.mubr.msk.f32.mxu1 %vm5327_vm0, %v5328_v4 }
 0x1f5   : > { %4468 = vmatmul.mubr.msk.f32.gmra.mrb[42].mxu0 %vm1001_vm15, %v1059_v15  ;;  %4535 = vmatmul.mubr.msk.f32.gmra.mrb[18].mxu1 %vm1001_vm15, %v5785_v37 }
 0x1f6   : > { %4537 = vmatprep.mubr.msk.f32.mxu1 %vm5327_vm0, %v5328_v4  ;;  %4682 = vmatprep.mubr.msk.f32.mxu0 %vm5327_vm0, %v5328_v4 }
 0x1f9   : > { %4538 = vmatmul.mubr.msk.f32.gmra.mrb[20].mxu1 %vm1001_vm15, %v5797_v40  ;;  %4683 = vmatmul.mubr.msk.f32.vlgmr.msra.gmra.mrb[44].mxu0 %vm1001_vm15, %v5783_v36 }
 0x1fa   : > { %4542 = vmatprep.mubr.msk.f32.mxu1 %vm5327_vm0, %v5328_v4  ;;  %4685 = vmatprep.mubr.msk.f32.mxu0 %vm5327_vm0, %v5328_v4 }
 0x1fb   : > { %4716 = vmatpush3.msra.mxu0 %v3888_v47 }
 0x1fc   : > { %4750 = vmatprep.subr.mxu0 %v5328_v4 }
 0x1fd   : > { %4543 = vmatmul.mubr.msk.f32.vlgmr.msra.gmra.mrb[22].mxu1 %vm1001_vm15, %v6072_v59  ;;  %4686 = vmatmul.mubr.msk.f32.gmra.mrb[46].mxu0 %vm1001_vm15, %v5789_v38 }
 0x1fe   : > { %4576 = vmatpush3.msra.mxu1 %v3829_v55  ;;  %4545 = vmatprep.mubr.msk.f32.mxu1 %vm5327_vm0, %v5328_v4 }
 0x1ff   : > { %4688 = vmatprep.mubr.msk.f32.mxu0 %vm5327_vm0, %v5328_v4  ;;  %4610 = vmatprep.subr.mxu1 %v5328_v4 }
 0x201   : > { %4546 = vmatmul.mubr.msk.f32.gmra.mrb[24].mxu1 %vm1001_vm15, %v5783_v36  ;;  %4689 = vmatmul.mubr.msk.f32.gmra.mrb[48].mxu0 %vm1001_vm15, %v5812_v19 }
 0x202   : > { %4548 = vmatprep.mubr.msk.f32.mxu1 %vm5327_vm0, %v5328_v4  ;;  %4691 = vmatprep.mubr.msk.f32.mxu0 %vm5327_vm0, %v5328_v4 }
 0x205   : > { %4549 = vmatmul.mubr.msk.f32.gmra.mrb[26].mxu1 %vm1001_vm15, %v5789_v38  ;;  %4692 = vmatmul.mubr.msk.f32.gmra.mrb[50].mxu0 %vm1001_vm15, %v5828_v45 }
 0x206   : > { %4551 = vmatprep.mubr.msk.f32.mxu1 %vm5327_vm0, %v5328_v4  ;;  %4694 = vmatprep.mubr.msk.f32.mxu0 %vm5327_vm0, %v5328_v4 }
 0x209   : > { %4552 = vmatmul.mubr.msk.f32.gmra.mrb[28].mxu1 %vm1001_vm15, %v5812_v19  ;;  %4695 = vmatmul.mubr.msk.f32.gmra.mrb[52].mxu0 %vm1001_vm15, %v5842_v49 }
 0x20a   : > { %4554 = vmatprep.mubr.msk.f32.mxu1 %vm5327_vm0, %v5328_v4  ;;  %4697 = vmatprep.mubr.msk.f32.mxu0 %vm5327_vm0, %v5328_v4 }
 0x20d   : > { %4555 = vmatmul.mubr.msk.f32.gmra.mrb[30].mxu1 %vm1001_vm15, %v5828_v45  ;;  %4698 = vmatmul.mubr.msk.f32.gmra.mrb[54].mxu0 %vm1001_vm15, %v5856_v53 }
 0x20e   : > { %4557 = vmatprep.mubr.msk.f32.mxu1 %vm5327_vm0, %v5328_v4  ;;  %4700 = vmatprep.mubr.msk.f32.mxu0 %vm5327_vm0, %v5328_v4 }
 0x211   : > { %4558 = vmatmul.mubr.msk.f32.gmra.mrb[32].mxu1 %vm1001_vm15, %v5842_v49  ;;  %4701 = vmatmul.mubr.msk.f32.gmra.mrb[56].mxu0 %vm1001_vm15, %v5870_v57 }
 0x212   : > { %4560 = vmatprep.mubr.msk.f32.mxu1 %vm5327_vm0, %v5328_v4  ;;  %4703 = vmatprep.mubr.msk.f32.mxu0 %vm5327_vm0, %v5328_v4 }
 0x215   : > { %4561 = vmatmul.mubr.msk.f32.gmra.mrb[34].mxu1 %vm1001_vm15, %v5856_v53  ;;  %4704 = vmatmul.mubr.msk.f32.gmra.mrb[58].mxu0 %vm1001_vm15, %v5884_v60 }
 0x216   : > { %4563 = vmatprep.mubr.msk.f32.mxu1 %vm5327_vm0, %v5328_v4  ;;  %4706 = vmatprep.mubr.msk.f32.mxu0 %vm5327_vm0, %v5328_v4 }
 0x219   : > { %4564 = vmatmul.mubr.msk.f32.gmra.mrb[36].mxu1 %vm1001_vm15, %v5870_v57  ;;  %4707 = vmatmul.mubr.msk.f32.gmra.mrb[60].mxu0 %vm1001_vm15, %v5898_v0 }
 0x21a   : > { %4566 = vmatprep.mubr.msk.f32.mxu1 %vm5327_vm0, %v5328_v4  ;;  %4709 = vmatprep.mubr.msk.f32.mxu0 %vm5327_vm0, %v5328_v4 }
 0x21d   : > { %4567 = vmatmul.mubr.msk.f32.gmra.mrb[38].mxu1 %vm1001_vm15, %v5884_v60  ;;  %4710 = vmatmul.mubr.msk.f32.gmra.mrb[62].mxu0 %vm1001_vm15, %v5785_v37 }
 0x21e   : > { %4569 = vmatprep.mubr.msk.f32.mxu1 %vm5327_vm0, %v5328_v4  ;;  %4712 = vmatprep.mubr.msk.f32.mxu0 %vm5327_vm0, %v5328_v4 }
 0x221   : > { %4570 = vmatmul.mubr.msk.f32.gmra.mrb[40].mxu1 %vm1001_vm15, %v5898_v0  ;;  %4713 = vmatmul.mubr.msk.f32.gmra.mrb[64].mxu0 %vm1001_vm15, %v5797_v40 }
 0x222   : > { %4572 = vmatprep.mubr.msk.f32.mxu1 %vm5327_vm0, %v5328_v4  ;;  %4717 = vmatprep.mubr.msk.f32.mxu0 %vm5327_vm0, %v5328_v4 }
 0x225   : > { %4573 = vmatmul.mubr.msk.f32.gmra.mrb[42].mxu1 %vm1001_vm15, %v5785_v37  ;;  %4718 = vmatmul.mubr.msk.f32.vlgmr.msra.gmra.mrb[44].mxu0 %vm1001_vm15, %v5805_v18 }
 0x226   : > { %4577 = vmatprep.mubr.msk.f32.mxu1 %vm5327_vm0, %v5328_v4  ;;  %4720 = vmatprep.mubr.msk.f32.mxu0 %vm5327_vm0, %v5328_v4 }
 0x227   : > { %4751 = vmatpush3.msra.mxu0 %v3912_v63 }
 0x228   : > { %4785 = vmatprep.subr.mxu0 %v5328_v4 }
 0x229   : > { %4578 = vmatmul.mubr.msk.f32.vlgmr.msra.gmra.mrb[22].mxu1 %vm1001_vm15, %v5785_v37  ;;  %4721 = vmatmul.mubr.msk.f32.gmra.mrb[46].mxu0 %vm1001_vm15, %v5821_v42 }
 0x22a   : > { %4611 = vmatpush3.msra.mxu1 %v3853_v10  ;;  %4580 = vmatprep.mubr.msk.f32.mxu1 %vm5327_vm0, %v5328_v4 }
 0x22b   : > { %4723 = vmatprep.mubr.msk.f32.mxu0 %vm5327_vm0, %v5328_v4  ;;  %4645 = vmatprep.subr.mxu1 %v5328_v4 }
 0x22d   : > { %4581 = vmatmul.mubr.msk.f32.gmra.mrb[24].mxu1 %vm1001_vm15, %v5805_v18  ;;  %4724 = vmatmul.mubr.msk.f32.gmra.mrb[48].mxu0 %vm1001_vm15, %v5835_v46 }
 0x22e   : > { %4583 = vmatprep.mubr.msk.f32.mxu1 %vm5327_vm0, %v5328_v4  ;;  %4726 = vmatprep.mubr.msk.f32.mxu0 %vm5327_vm0, %v5328_v4 }
 0x231   : > { %4584 = vmatmul.mubr.msk.f32.gmra.mrb[26].mxu1 %vm1001_vm15, %v5821_v42  ;;  %4727 = vmatmul.mubr.msk.f32.gmra.mrb[50].mxu0 %vm1001_vm15, %v5849_v50  ;;  %v3924_v42 = vld [vmem:[%s6923_s3 + $0x58] sm:$0xff] }
 0x232   : > { %4586 = vmatprep.mubr.msk.f32.mxu1 %vm5327_vm0, %v5328_v4  ;;  %4729 = vmatprep.mubr.msk.f32.mxu0 %vm5327_vm0, %v5328_v4 }
 0x235   : > { %4587 = vmatmul.mubr.msk.f32.gmra.mrb[28].mxu1 %vm1001_vm15, %v5835_v46  ;;  %4730 = vmatmul.mubr.msk.f32.gmra.mrb[52].mxu0 %vm1001_vm15, %v5863_v54  ;;  %v3865_v46 = vld [vmem:[%s6923_s3 + $0x38] sm:$0xff] }
 0x236   : > { %4589 = vmatprep.mubr.msk.f32.mxu1 %vm5327_vm0, %v5328_v4  ;;  %4732 = vmatprep.mubr.msk.f32.mxu0 %vm5327_vm0, %v5328_v4 }
 0x239   : > { %4590 = vmatmul.mubr.msk.f32.gmra.mrb[30].mxu1 %vm1001_vm15, %v5849_v50  ;;  %4733 = vmatmul.mubr.msk.f32.gmra.mrb[54].mxu0 %vm1001_vm15, %v5877_v58  ;;  %v1087_v50 = vrot.slane %v5812_v19, 1 }
 0x23a   : > { %4592 = vmatprep.mubr.msk.f32.mxu1 %vm5327_vm0, %v5328_v4  ;;  %4735 = vmatprep.mubr.msk.f32.mxu0 %vm5327_vm0, %v5328_v4 }
 0x23d   : > { %4593 = vmatmul.mubr.msk.f32.gmra.mrb[32].mxu1 %vm1001_vm15, %v5863_v54  ;;  %4736 = vmatmul.mubr.msk.f32.gmra.mrb[56].mxu0 %vm1001_vm15, %v5891_v62 }
 0x23e   : > { %4595 = vmatprep.mubr.msk.f32.mxu1 %vm5327_vm0, %v5328_v4  ;;  %4738 = vmatprep.mubr.msk.f32.mxu0 %vm5327_vm0, %v5328_v4 }
 0x241   : > { %4596 = vmatmul.mubr.msk.f32.gmra.mrb[34].mxu1 %vm1001_vm15, %v5877_v58  ;;  %4739 = vmatmul.mubr.msk.f32.gmra.mrb[58].mxu0 %vm1001_vm15, %v5905_v1  ;;  %v3948_v58 = vld [vmem:[%s6923_s3 + $0x68] sm:$0xff] }
 0x242   : > { %4598 = vmatprep.mubr.msk.f32.mxu1 %vm5327_vm0, %v5328_v4  ;;  %4741 = vmatprep.mubr.msk.f32.mxu0 %vm5327_vm0, %v5328_v4 }
 0x245   : > { %4599 = vmatmul.mubr.msk.f32.gmra.mrb[36].mxu1 %vm1001_vm15, %v5891_v62  ;;  %4742 = vmatmul.mubr.msk.f32.gmra.mrb[60].mxu0 %vm1001_vm15, %v5920_v6  ;;  %v1091_v62 = vrot.slane %v5842_v49, 1 }
 0x246   : > { %4601 = vmatprep.mubr.msk.f32.mxu1 %vm5327_vm0, %v5328_v4  ;;  %4744 = vmatprep.mubr.msk.f32.mxu0 %vm5327_vm0, %v5328_v4 }
 0x249   : > { %4602 = vmatmul.mubr.msk.f32.gmra.mrb[38].mxu1 %vm1001_vm15, %v5905_v1  ;;  %4745 = vmatmul.mubr.msk.f32.gmra.mrb[62].mxu0 %vm1001_vm15, %v5936_v8 }
 0x24a   : > { %4604 = vmatprep.mubr.msk.f32.mxu1 %vm5327_vm0, %v5328_v4  ;;  %4747 = vmatprep.mubr.msk.f32.mxu0 %vm5327_vm0, %v5328_v4 }
 0x24d   : > { %4605 = vmatmul.mubr.msk.f32.gmra.mrb[40].mxu1 %vm1001_vm15, %v5920_v6  ;;  %4748 = vmatmul.mubr.msk.f32.gmra.mrb[64].mxu0 %vm1001_vm15, %v5923_v7  ;;  %v1095_v7 = vrot.slane %v5870_v57, 1 }
 0x24e   : > { %4607 = vmatprep.mubr.msk.f32.mxu1 %vm5327_vm0, %v5328_v4  ;;  %4752 = vmatprep.mubr.msk.f32.mxu0 %vm5327_vm0, %v5328_v4 }
 0x24f   : > { %v6424_v12 = vsel %vm304_vm1, %v1095_v7, %v1097_v11 }
 0x251   : > { %4608 = vmatmul.mubr.msk.f32.gmra.mrb[42].mxu1 %vm1001_vm15, %v5908_v5  ;;  %4753 = vmatmul.mubr.msk.f32.vlgmr.msra.gmra.mrb[44].mxu0 %vm1001_vm15, %v5789_v38  ;;  %v1093_v5 = vrot.slane %v5856_v53, 1 }
 0x252   : > { %4612 = vmatprep.mubr.msk.f32.mxu1 %vm5327_vm0, %v5328_v4  ;;  %4755 = vmatprep.mubr.msk.f32.mxu0 %vm5327_vm0, %v5328_v4 }
 0x253   : > { %4786 = vmatpush3.msra.mxu0 %v3924_v42  ;;  %v6400_v6 = vsel %vm304_vm1, %v1091_v62, %v1093_v5  ;;  %v6412_v8 = vsel %vm304_vm1, %v1093_v5, %v1095_v7 }
 0x255   : > { %4613 = vmatmul.mubr.msk.f32.vlgmr.msra.gmra.mrb[22].mxu1 %vm1001_vm15, %v5783_v36  ;;  %4756 = vmatmul.mubr.msk.f32.gmra.mrb[46].mxu0 %vm1001_vm15, %v5812_v19 }
 0x256   : > { %4646 = vmatpush3.msra.mxu1 %v3865_v46  ;;  %4615 = vmatprep.mubr.msk.f32.mxu1 %vm5327_vm0, %v5328_v4 }
 0x257   : > { %4758 = vmatprep.mubr.msk.f32.mxu0 %vm5327_vm0, %v5328_v4  ;;  %4820 = vmatprep.subr.mxu1 %v5328_v4 }
 0x259   : > { %4616 = vmatmul.mubr.msk.f32.gmra.mrb[24].mxu1 %vm1001_vm15, %v5789_v38  ;;  %4759 = vmatmul.mubr.msk.f32.gmra.mrb[48].mxu0 %vm1001_vm15, %v5828_v45 }
 0x25a   : > { %4618 = vmatprep.mubr.msk.f32.mxu1 %vm5327_vm0, %v5328_v4  ;;  %4761 = vmatprep.mubr.msk.f32.mxu0 %vm5327_vm0, %v5328_v4 }
 0x25d   : > { %4619 = vmatmul.mubr.msk.f32.gmra.mrb[26].mxu1 %vm1001_vm15, %v5812_v19  ;;  %4762 = vmatmul.mubr.msk.f32.gmra.mrb[50].mxu0 %vm1001_vm15, %v5842_v49  ;;  %v1089_v19 = vrot.slane %v5828_v45, 1 }
 0x25e   : > { %4621 = vmatprep.mubr.msk.f32.mxu1 %vm5327_vm0, %v5328_v4  ;;  %4764 = vmatprep.mubr.msk.f32.mxu0 %vm5327_vm0, %v5328_v4 }
 0x25f   : > { %v6388_v1 = vsel %vm304_vm1, %v1089_v19, %v1091_v62 }
 0x261   : > { %4622 = vmatmul.mubr.msk.f32.gmra.mrb[28].mxu1 %vm1001_vm15, %v5828_v45  ;;  %4765 = vmatmul.mubr.msk.f32.gmra.mrb[52].mxu0 %vm1001_vm15, %v5856_v53  ;;  %v6375_v45 = vsel %vm304_vm1, %v1087_v50, %v1089_v19 }
 0x262   : > { %4624 = vmatprep.mubr.msk.f32.mxu1 %vm5327_vm0, %v5328_v4  ;;  %4767 = vmatprep.mubr.msk.f32.mxu0 %vm5327_vm0, %v5328_v4 }
 0x265   : > { %4625 = vmatmul.mubr.msk.f32.gmra.mrb[30].mxu1 %vm1001_vm15, %v5842_v49  ;;  %4768 = vmatmul.mubr.msk.f32.gmra.mrb[54].mxu0 %vm1001_vm15, %v5870_v57 }
 0x266   : > { %4627 = vmatprep.mubr.msk.f32.mxu1 %vm5327_vm0, %v5328_v4  ;;  %4770 = vmatprep.mubr.msk.f32.mxu0 %vm5327_vm0, %v5328_v4 }
 0x269   : > { %4628 = vmatmul.mubr.msk.f32.gmra.mrb[32].mxu1 %vm1001_vm15, %v5856_v53  ;;  %4771 = vmatmul.mubr.msk.f32.gmra.mrb[56].mxu0 %vm1001_vm15, %v5884_v60 }
 0x26a   : > { %4630 = vmatprep.mubr.msk.f32.mxu1 %vm5327_vm0, %v5328_v4  ;;  %4773 = vmatprep.mubr.msk.f32.mxu0 %vm5327_vm0, %v5328_v4 }
 0x26d   : > { %4631 = vmatmul.mubr.msk.f32.gmra.mrb[34].mxu1 %vm1001_vm15, %v5870_v57  ;;  %4774 = vmatmul.mubr.msk.f32.gmra.mrb[58].mxu0 %vm1001_vm15, %v5898_v0 }
 0x26e   : > { %4633 = vmatprep.mubr.msk.f32.mxu1 %vm5327_vm0, %v5328_v4  ;;  %4776 = vmatprep.mubr.msk.f32.mxu0 %vm5327_vm0, %v5328_v4 }
 0x271   : > { %4634 = vmatmul.mubr.msk.f32.gmra.mrb[36].mxu1 %vm1001_vm15, %v5884_v60  ;;  %4777 = vmatmul.mubr.msk.f32.gmra.mrb[60].mxu0 %vm1001_vm15, %v5785_v37 }
 0x272   : > { %4636 = vmatprep.mubr.msk.f32.mxu1 %vm5327_vm0, %v5328_v4  ;;  %4779 = vmatprep.mubr.msk.f32.mxu0 %vm5327_vm0, %v5328_v4 }
 0x275   : > { %4637 = vmatmul.mubr.msk.f32.gmra.mrb[38].mxu1 %vm1001_vm15, %v5898_v0  ;;  %4780 = vmatmul.mubr.msk.f32.gmra.mrb[62].mxu0 %vm1001_vm15, %v5805_v18  ;;  %v6349_v18 = vrot.slane %v5789_v38, 1 }
 0x276   : > { %4639 = vmatprep.mubr.msk.f32.mxu1 %vm5327_vm0, %v5328_v4  ;;  %4782 = vmatprep.mubr.msk.f32.mxu0 %vm5327_vm0, %v5328_v4 }
 0x277   : > { %v6353_v54 = vsel %vm304_vm1, %v6349_v18, %v1087_v50 }
 0x279   : > { %4640 = vmatmul.mubr.msk.f32.gmra.mrb[40].mxu1 %vm1001_vm15, %v5785_v37  ;;  %4783 = vmatmul.mubr.msk.f32.gmra.mrb[64].mxu0 %vm1001_vm15, %v5794_v39  ;;  %v1084_v39 = vrot.slane %v5783_v36, 1 }
 0x27a   : > { %4642 = vmatprep.mubr.msk.f32.mxu1 %vm5327_vm0, %v5328_v4  ;;  %4787 = vmatprep.mubr.msk.f32.mxu0 %vm5327_vm0, %v5328_v4 }
 0x27d   : > { %4643 = vmatmul.mubr.msk.f32.gmra.mrb[42].mxu1 %vm1001_vm15, %v5797_v40  ;;  %4788 = vmatmul.mubr.msk.f32.vlgmr.msra.gmra.mrb[44].mxu0 %vm1001_vm15, %v6353_v54  ;;  %v6372_v40 = vsel %vm304_vm1, %v1084_v39, %v6349_v18 }
 0x27e   : > { %4647 = vmatprep.mubr.msk.f32.mxu1 %vm5327_vm0, %v5328_v4  ;;  %4790 = vmatprep.mubr.msk.f32.mxu0 %vm5327_vm0, %v5328_v4 }
 0x281   : > { %4648 = vmatmul.mubr.msk.f32.vlgmr.msra.gmra.mrb[22].mxu1 %vm1001_vm15, %v6372_v40  ;;  %4791 = vmatmul.mubr.msk.f32.gmra.mrb[46].mxu0 %vm1001_vm15, %v6375_v45 }
 0x282   : > { %4821 = vmatpush3.msra.mxu1 %v3948_v58  ;;  %4650 = vmatprep.mubr.msk.f32.mxu1 %vm5327_vm0, %v5328_v4 }
 0x283   : > { %4793 = vmatprep.mubr.msk.f32.mxu0 %vm5327_vm0, %v5328_v4  ;;  %4855 = vmatprep.subr.mxu1 %v5328_v4 }
 0x285   : > { %4651 = vmatmul.mubr.msk.f32.gmra.mrb[24].mxu1 %vm1001_vm15, %v6353_v54  ;;  %4794 = vmatmul.mubr.msk.f32.gmra.mrb[48].mxu0 %vm1001_vm15, %v6388_v1 }
 0x286   : > { %4653 = vmatprep.mubr.msk.f32.mxu1 %vm5327_vm0, %v5328_v4  ;;  %4796 = vmatprep.mubr.msk.f32.mxu0 %vm5327_vm0, %v5328_v4 }
 0x289   : > { %4654 = vmatmul.mubr.msk.f32.gmra.mrb[26].mxu1 %vm1001_vm15, %v6375_v45  ;;  %4797 = vmatmul.mubr.msk.f32.gmra.mrb[50].mxu0 %vm1001_vm15, %v6400_v6 }
 0x28a   : > { %4656 = vmatprep.mubr.msk.f32.mxu1 %vm5327_vm0, %v5328_v4  ;;  %4799 = vmatprep.mubr.msk.f32.mxu0 %vm5327_vm0, %v5328_v4 }
 0x28d   : > { %4657 = vmatmul.mubr.msk.f32.gmra.mrb[28].mxu1 %vm1001_vm15, %v6388_v1  ;;  %4800 = vmatmul.mubr.msk.f32.gmra.mrb[52].mxu0 %vm1001_vm15, %v6412_v8 }
 0x28e   : > { %4659 = vmatprep.mubr.msk.f32.mxu1 %vm5327_vm0, %v5328_v4  ;;  %4802 = vmatprep.mubr.msk.f32.mxu0 %vm5327_vm0, %v5328_v4 }
 0x291   : > { %4660 = vmatmul.mubr.msk.f32.gmra.mrb[30].mxu1 %vm1001_vm15, %v6400_v6  ;;  %4803 = vmatmul.mubr.msk.f32.gmra.mrb[54].mxu0 %vm1001_vm15, %v6424_v12 }
 0x292   : > { %4662 = vmatprep.mubr.msk.f32.mxu1 %vm5327_vm0, %v5328_v4  ;;  %4805 = vmatprep.mubr.msk.f32.mxu0 %vm5327_vm0, %v5328_v4 }
 0x295   : > { %4663 = vmatmul.mubr.msk.f32.gmra.mrb[32].mxu1 %vm1001_vm15, %v6412_v8  ;;  %4806 = vmatmul.mubr.msk.f32.gmra.mrb[56].mxu0 %vm1001_vm15, %v6436_v2 }
 0x296   : > { %4665 = vmatprep.mubr.msk.f32.mxu1 %vm5327_vm0, %v5328_v4  ;;  %4808 = vmatprep.mubr.msk.f32.mxu0 %vm5327_vm0, %v5328_v4 }
 0x299   : > { %4666 = vmatmul.mubr.msk.f32.gmra.mrb[34].mxu1 %vm1001_vm15, %v6424_v12  ;;  %4809 = vmatmul.mubr.msk.f32.gmra.mrb[58].mxu0 %vm1001_vm15, %v6449_v17 }
 0x29a   : > { %4668 = vmatprep.mubr.msk.f32.mxu1 %vm5327_vm0, %v5328_v4  ;;  %4811 = vmatprep.mubr.msk.f32.mxu0 %vm5327_vm0, %v5328_v4 }
 0x29d   : > { %4669 = vmatmul.mubr.msk.f32.gmra.mrb[36].mxu1 %vm1001_vm15, %v6436_v2  ;;  %4812 = vmatmul.mubr.msk.f32.gmra.mrb[60].mxu0 %vm1001_vm15, %v6072_v59 }
 0x29e   : > { %4671 = vmatprep.mubr.msk.f32.mxu1 %vm5327_vm0, %v5328_v4  ;;  %4814 = vmatprep.mubr.msk.f32.mxu0 %vm5327_vm0, %v5328_v4 }
 0x2a0   : > { %v1359_v37 = vpop.f32.mrb[22].mxu0 }
 0x2a1   : > { %v4439_v20 = vpop.f32.mrb[23].mxu0  ;;  %4672 = vmatmul.mubr.msk.f32.gmra.mrb[38].mxu1 %vm1001_vm15, %v6449_v17  ;;  %4815 = vmatmul.mubr.msk.f32.gmra.mrb[62].mxu0 %vm1001_vm15, %v5783_v36 }
 0x2a2   : > { %4674 = vmatprep.mubr.msk.f32.mxu1 %vm5327_vm0, %v5328_v4  ;;  %4817 = vmatprep.mubr.msk.f32.mxu0 %vm5327_vm0, %v5328_v4 }
 0x2a4   : > { %v1364_v22 = vpop.f32.mrb[24].mxu0  ;;  %v1636_v24 = vpop.f32.mrb[0].mxu1 }
 0x2a5   : > { %v4972_v26 = vadd.f32 %v1636_v24, %v1359_v37  ;;  %v4442_v28 = vpop.f32.mrb[25].mxu0  ;;  %v4509_v29 = vpop.f32.mrb[1].mxu1  ;;  %4675 = vmatmul.mubr.msk.f32.gmra.mrb[40].mxu1 %vm1001_vm15, %v6072_v59  ;;  %4818 = vmatmul.mubr.msk.f32.gmra.mrb[64].mxu0 %vm1001_vm15, %v5789_v38 }
 0x2a6   : > { %4677 = vmatprep.mubr.msk.f32.mxu1 %vm5327_vm0, %v5328_v4 }
 0x2a7   : > { %v1701_v27 = vmul.f32 %v4972_v26, %v5737_v41 }
 0x2a8   : > { %v1369_v31 = vpop.f32.mrb[26].mxu0  ;;  %v1641_v16 = vpop.f32.mrb[2].mxu1 }
 0x2a9   : > { %1713 = vst.msk [vmem:[%s6483_s22] sm:$0xff] %vm1712_vm5, %v1701_v27  ;;  %v4973_v21 = vadd.f32 %v1641_v16, %v1364_v22  ;;  %v4445_v32 = vpop.f32.mrb[27].mxu0  ;;  %v4512_v38 = vpop.f32.mrb[3].mxu1  ;;  %4678 = vmatmul.mubr.msk.f32.gmra.mrb[42].mxu1 %vm1001_vm15, %v5783_v36  ;;  %v1753_v33 = vmul.f32 %v1701_v27, %v1701_v27  ;;  %v1725_v44 = vsel %vm1712_vm5, %v1701_v27, 0.0 }
 0x2aa   : > { %4822 = vmatprep.mubr.msk.f32.mxu1 %vm5327_vm0, %v5328_v4 }
 0x2ab   : > { %v1702_v35 = vmul.f32 %v4973_v21, %v5739_v43  ;;  %v1764_v46 = vsel %vm1712_vm5, %v1753_v33, 0.0 }
 0x2ac   : > { %v1374_v15 = vpop.f32.mrb[28].mxu0  ;;  %v1646_v25 = vpop.f32.mrb[4].mxu1 }
 0x2ad   : > { %1714 = vst.msk [vmem:[%s6483_s22 + $0x8] sm:$0xff] %vm1712_vm5, %v1702_v35  ;;  %v1726_v47 = vsel %vm1712_vm5, %v1702_v35, 0.0  ;;  %v1754_v52 = vmul.f32 %v1702_v35, %v1702_v35  ;;  %v4974_v55 = vadd.f32 %v1646_v25, %v1369_v31  ;;  %v4448_v63 = vpop.f32.mrb[29].mxu0  ;;  %v4515_v10 = vpop.f32.mrb[5].mxu1  ;;  %4823 = vmatmul.mubr.msk.f32.vlgmr.msra.gmra.mrb[44].mxu1 %vm1001_vm15, %v6372_v40 }
 0x2ae   : > { %v1727_v42 = vadd.f32 %v1726_v47, %v1725_v44  ;;  %4856 = vmatpush3.msra.mxu1 %v3947_v34  ;;  %4825 = vmatprep.mubr.msk.f32.mxu1 %vm5327_vm0, %v5328_v4 }
 0x2af   : > { %v1765_v50 = vsel %vm1712_vm5, %v1754_v52, 0.0  ;;  %v1703_v19 = vmul.f32 %v4974_v55, %v5746_v51  ;;  %4890 = vmatprep.subr.mxu1 %v5328_v4 }
 0x2b0   : > { %v1766_v58 = vadd.f32 %v1765_v50, %v1764_v46  ;;  %v1379_v62 = vpop.f32.mrb[30].mxu0  ;;  %v1651_v5 = vpop.f32.mrb[6].mxu1 }
 0x2b1   : > { %1715 = vst.msk [vmem:[%s6483_s22 + $0x10] sm:$0xff] %vm1712_vm5, %v1703_v19  ;;  %v1728_v7 = vsel %vm1712_vm5, %v1703_v19, 0.0  ;;  %v1755_v11 = vmul.f32 %v1703_v19, %v1703_v19  ;;  %v4975_v13 = vadd.f32 %v1651_v5, %v1374_v15  ;;  %v4451_v37 = vpop.f32.mrb[31].mxu0  ;;  %v4518_v20 = vpop.f32.mrb[7].mxu1  ;;  %4826 = vmatmul.mubr.msk.f32.gmra.mrb[46].mxu1 %vm1001_vm15, %v6353_v54 }
 0x2b2   : > { %v1729_v22 = vadd.f32 %v1728_v7, %v1727_v42  ;;  %4828 = vmatprep.mubr.msk.f32.mxu1 %vm5327_vm0, %v5328_v4 }
 0x2b3   : > { %v1767_v24 = vsel %vm1712_vm5, %v1755_v11, 0.0  ;;  %v1704_v26 = vmul.f32 %v4975_v13, %v5750_v56 }
 0x2b4   : > { %v1768_v28 = vadd.f32 %v1767_v24, %v1766_v58  ;;  %v1384_v29 = vpop.f32.mrb[32].mxu0  ;;  %v1656_v27 = vpop.f32.mrb[8].mxu1 }
 0x2b5   : > { %1716 = vst.msk [vmem:[%s6483_s22 + $0x18] sm:$0xff] %vm1712_vm5, %v1704_v26  ;;  %v1730_v31 = vsel %vm1712_vm5, %v1704_v26, 0.0  ;;  %v1756_v16 = vmul.f32 %v1704_v26, %v1704_v26  ;;  %v4976_v21 = vadd.f32 %v1656_v27, %v1379_v62  ;;  %v4454_v32 = vpop.f32.mrb[33].mxu0  ;;  %v4521_v38 = vpop.f32.mrb[9].mxu1  ;;  %4829 = vmatmul.mubr.msk.f32.gmra.mrb[48].mxu1 %vm1001_vm15, %v6375_v45 }
 0x2b6   : > { %v1731_v33 = vadd.f32 %v1730_v31, %v1729_v22  ;;  %4831 = vmatprep.mubr.msk.f32.mxu1 %vm5327_vm0, %v5328_v4 }
 0x2b7   : > { %v1769_v35 = vsel %vm1712_vm5, %v1756_v16, 0.0  ;;  %v1705_v34 = vmul.f32 %v4976_v21, %v5754_v61 }
 0x2b8   : > { %v1770_v15 = vadd.f32 %v1769_v35, %v1768_v28  ;;  %v1389_v25 = vpop.f32.mrb[34].mxu0  ;;  %v1661_v44 = vpop.f32.mrb[10].mxu1 }
 0x2b9   : > { %1717 = vst.msk [vmem:[%s6483_s22 + $0x20] sm:$0xff] %vm1712_vm5, %v1705_v34  ;;  %v1732_v47 = vsel %vm1712_vm5, %v1705_v34, 0.0  ;;  %v1757_v52 = vmul.f32 %v1705_v34, %v1705_v34  ;;  %v4977_v55 = vadd.f32 %v1661_v44, %v1384_v29  ;;  %v4457_v63 = vpop.f32.mrb[35].mxu0  ;;  %v4524_v10 = vpop.f32.mrb[11].mxu1  ;;  %4832 = vmatmul.mubr.msk.f32.gmra.mrb[50].mxu1 %vm1001_vm15, %v6388_v1 }
 0x2ba   : > { %v1733_v42 = vadd.f32 %v1732_v47, %v1731_v33  ;;  %4834 = vmatprep.mubr.msk.f32.mxu1 %vm5327_vm0, %v5328_v4 }
 0x2bb   : > { %v1771_v46 = vsel %vm1712_vm5, %v1757_v52, 0.0  ;;  %v1706_v50 = vmul.f32 %v4977_v55, %v5758_v3 }
 0x2bc   : > { %v1772_v19 = vadd.f32 %v1771_v46, %v1770_v15  ;;  %v1394_v58 = vpop.f32.mrb[36].mxu0  ;;  %v1666_v62 = vpop.f32.mrb[12].mxu1 }
 0x2bd   : > { %1718 = vst.msk [vmem:[%s6483_s22 + $0x28] sm:$0xff] %vm1712_vm5, %v1706_v50  ;;  %v1734_v5 = vsel %vm1712_vm5, %v1706_v50, 0.0  ;;  %v1758_v7 = vmul.f32 %v1706_v50, %v1706_v50  ;;  %v4978_v11 = vadd.f32 %v1666_v62, %v1389_v25  ;;  %v4460_v13 = vpop.f32.mrb[37].mxu0  ;;  %v4527_v37 = vpop.f32.mrb[13].mxu1  ;;  %4835 = vmatmul.mubr.msk.f32.gmra.mrb[52].mxu1 %vm1001_vm15, %v6400_v6 }
 0x2be   : > { %v1735_v20 = vadd.f32 %v1734_v5, %v1733_v42  ;;  %4837 = vmatprep.mubr.msk.f32.mxu1 %vm5327_vm0, %v5328_v4 }
 0x2bf   : > { %v1773_v22 = vsel %vm1712_vm5, %v1758_v7, 0.0  ;;  %v1707_v24 = vmul.f32 %v4978_v11, %v5762_v9 }
 0x2c0   : > { %v1774_v26 = vadd.f32 %v1773_v22, %v1772_v19  ;;  %v1399_v28 = vpop.f32.mrb[38].mxu0  ;;  %v1671_v29 = vpop.f32.mrb[14].mxu1 }
 0x2c1   : > { %1719 = vst.msk [vmem:[%s6483_s22 + $0x30] sm:$0xff] %vm1712_vm5, %v1707_v24  ;;  %v1736_v27 = vsel %vm1712_vm5, %v1707_v24, 0.0  ;;  %v1759_v31 = vmul.f32 %v1707_v24, %v1707_v24  ;;  %v4979_v16 = vadd.f32 %v1671_v29, %v1394_v58  ;;  %v4463_v21 = vpop.f32.mrb[39].mxu0  ;;  %v4530_v32 = vpop.f32.mrb[15].mxu1  ;;  %4838 = vmatmul.mubr.msk.f32.gmra.mrb[54].mxu1 %vm1001_vm15, %v6412_v8 }
 0x2c2   : > { %v1737_v38 = vadd.f32 %v1736_v27, %v1735_v20  ;;  %4840 = vmatprep.mubr.msk.f32.mxu1 %vm5327_vm0, %v5328_v4 }
 0x2c3   : > { %v1775_v33 = vsel %vm1712_vm5, %v1759_v31, 0.0  ;;  %v1708_v35 = vmul.f32 %v4979_v16, %v5766_v14 }
 0x2c4   : > { %v1776_v34 = vadd.f32 %v1775_v33, %v1774_v26  ;;  %v1404_v15 = vpop.f32.mrb[40].mxu0  ;;  %v1676_v25 = vpop.f32.mrb[16].mxu1 }
 0x2c5   : > { %1720 = vst.msk [vmem:[%s6483_s22 + $0x38] sm:$0xff] %vm1712_vm5, %v1708_v35  ;;  %v1738_v44 = vsel %vm1712_vm5, %v1708_v35, 0.0  ;;  %v1760_v47 = vmul.f32 %v1708_v35, %v1708_v35  ;;  %v4980_v52 = vadd.f32 %v1676_v25, %v1399_v28  ;;  %v4466_v55 = vpop.f32.mrb[41].mxu0  ;;  %v4533_v63 = vpop.f32.mrb[17].mxu1  ;;  %4841 = vmatmul.mubr.msk.f32.gmra.mrb[56].mxu1 %vm1001_vm15, %v6424_v12 }
 0x2c6   : > { %v1739_v10 = vadd.f32 %v1738_v44, %v1737_v38  ;;  %4843 = vmatprep.mubr.msk.f32.mxu1 %vm5327_vm0, %v5328_v4  ;;  %v5307_v44 = vld [vmem:[#allocation2] sm:$0xff]  ;;  %v5309_v55 = vld [vmem:[#allocation2 + $0x10] sm:$0xff]  ;;  %v5310_v63 = vld [vmem:[#allocation2 + $0x18] sm:$0xff] }
 0x2c7   : > { %v1777_v42 = vsel %vm1712_vm5, %v1760_v47, 0.0  ;;  %v1709_v46 = vmul.f32 %v4980_v52, %v5770_v23  ;;  %v3971_v47 = vld [vmem:[%s6923_s3 + $0x70] sm:$0xff]  ;;  %v5308_v52 = vld [vmem:[#allocation2 + $0x8] sm:$0xff] }
 0x2c8   : > { %v1778_v50 = vadd.f32 %v1777_v42, %v1776_v34  ;;  %v1409_v19 = vpop.f32.mrb[42].mxu0  ;;  %v1681_v58 = vpop.f32.mrb[18].mxu1 }
 0x2c9   : > { %1721 = vst.msk [vmem:[%s6483_s22 + $0x40] sm:$0xff] %vm1712_vm5, %v1709_v46  ;;  %v1740_v62 = vsel %vm1712_vm5, %v1709_v46, 0.0  ;;  %v1761_v5 = vmul.f32 %v1709_v46, %v1709_v46  ;;  %v4981_v7 = vadd.f32 %v1681_v58, %v1404_v15  ;;  %v4469_v11 = vpop.f32.mrb[43].mxu0  ;;  %v4536_v13 = vpop.f32.mrb[19].mxu1  ;;  %4844 = vmatmul.mubr.msk.f32.gmra.mrb[58].mxu1 %vm1001_vm15, %v6436_v2 }
 0x2ca   : > { %v1741_v37 = vadd.f32 %v1740_v62, %v1739_v10  ;;  %4846 = vmatprep.mubr.msk.f32.mxu1 %vm5327_vm0, %v5328_v4  ;;  %v5315_v10 = vld [vmem:[#allocation2 + $0x30] sm:$0xff]  ;;  %v5317_v62 = vld [vmem:[#allocation2 + $0x40] sm:$0xff] }
 0x2cb   : > { %v1779_v20 = vsel %vm1712_vm5, %v1761_v5, 0.0  ;;  %v1710_v22 = vmul.f32 %v4981_v7, %v5774_v30  ;;  %v1111_v42 = vrot.slane %v5315_v10, 2  ;;  %v1115_v5 = vrot.slane %v5317_v62, 2 }
 0x2cc   : > { %v1780_v24 = vadd.f32 %v1779_v20, %v1778_v50  ;;  %v1686_v26 = vpop.f32.mrb[20].mxu1  ;;  %v5316_v50 = vld [vmem:[#allocation2 + $0x38] sm:$0xff] }
 0x2cd   : > { %1722 = vst.msk [vmem:[%s6483_s22 + $0x48] sm:$0xff] %vm1712_vm5, %v1710_v22  ;;  %v1742_v28 = vsel %vm1712_vm5, %v1710_v22, 0.0  ;;  %v1762_v29 = vmul.f32 %v1710_v22, %v1710_v22  ;;  %v4982_v27 = vadd.f32 %v1686_v26, %v1409_v19  ;;  %v4539_v31 = vpop.f32.mrb[21].mxu1  ;;  %4847 = vmatmul.mubr.msk.f32.gmra.mrb[60].mxu1 %vm1001_vm15, %v6449_v17  ;;  %v1113_v19 = vrot.slane %v5316_v50, 2 }
 0x2ce   : > { %v1743_v16 = vadd.f32 %v1742_v28, %v1741_v37  ;;  %4849 = vmatprep.mubr.msk.f32.mxu1 %vm5327_vm0, %v5328_v4 }
 0x2cf   : > { %v1781_v21 = vsel %vm1712_vm5, %v1762_v29, 0.0  ;;  %v1711_v32 = vmul.f32 %v4982_v27, %v5743_v48  ;;  %v1114_v58 = vsel %vm746_vm10, %v1111_v42, %v1113_v19  ;;  %v1116_v7 = vsel %vm746_vm10, %v1113_v19, %v1115_v5 }
 0x2d0   : > { %v1782_v38 = vadd.f32 %v1781_v21, %v1780_v24 }
 0x2d1   : > { %1724 = vst.msk [vmem:[%s6483_s22 + $0x50] sm:$0x1] %vm1723_vm6, %v1711_v32  ;;  %v1744_v33 = vsel %vm1723_vm6, %v1711_v32, 0.0  ;;  %v1763_v35 = vmul.f32 %v1711_v32, %v1711_v32  ;;  %4850 = vmatmul.mubr.msk.f32.gmra.mrb[62].mxu1 %vm1001_vm15, %v6072_v59 }
 0x2d2   : > { %v6587_v34 = vadd.f32 %v1744_v33, %v1743_v16  ;;  %4852 = vmatprep.mubr.msk.f32.mxu1 %vm5327_vm0, %v5328_v4 }
 0x2d3   : > { %v1783_v15 = vsel %vm1723_vm6, %v1763_v35, 0.0 }
 0x2d4   : > { %v6592_v25 = vadd.f32 %v1783_v15, %v1782_v38 }
 0x2d5   : > { %4853 = vmatmul.mubr.msk.f32.gmra.mrb[64].mxu1 %vm1001_vm15, %v5307_v44 }
 0x2d6   : > { %4857 = vmatprep.mubr.msk.f32.mxu1 %vm5327_vm0, %v5328_v4 }
 0x2d9   : > { %4858 = vmatmul.mubr.msk.f32.vlgmr.msra.gmra.mrb[44].mxu1 %vm1001_vm15, %v5307_v44 }
 0x2da   : > { %4891 = vmatpush3.msra.mxu1 %v3971_v47  ;;  %4860 = vmatprep.mubr.msk.f32.mxu1 %vm5327_vm0, %v5328_v4 }
 0x2db   : > { %4925 = vmatprep.subr.mxu1 %v5328_v4 }
 0x2dd   : > { %4861 = vmatmul.mubr.msk.f32.gmra.mrb[46].mxu1 %vm1001_vm15, %v5308_v52 }
 0x2de   : > { %4863 = vmatprep.mubr.msk.f32.mxu1 %vm5327_vm0, %v5328_v4 }
 0x2e1   : > { %4864 = vmatmul.mubr.msk.f32.gmra.mrb[48].mxu1 %vm1001_vm15, %v5309_v55 }
 0x2e2   : > { %4866 = vmatprep.mubr.msk.f32.mxu1 %vm5327_vm0, %v5328_v4 }
 0x2e5   : > { %4867 = vmatmul.mubr.msk.f32.gmra.mrb[50].mxu1 %vm1001_vm15, %v5310_v63 }
 0x2e6   : > { %4869 = vmatprep.mubr.msk.f32.mxu1 %vm5327_vm0, %v5328_v4 }
 0x2e9   : > { %4870 = vmatmul.mubr.msk.f32.gmra.mrb[52].mxu1 %vm1001_vm15, %v5842_v49  ;;  %v6633_v49 = vld [vmem:[#allocation2 + $0x48] sm:$0xff] }
 0x2ea   : > { %4872 = vmatprep.mubr.msk.f32.mxu1 %vm5327_vm0, %v5328_v4  ;;  %v1117_v11 = vrot.slane %v6633_v49, 2 }
 0x2ec   : > { %v1118_v37 = vsel %vm746_vm10, %v1115_v5, %v1117_v11 }
 0x2ed   : > { %4873 = vmatmul.mubr.msk.f32.gmra.mrb[54].mxu1 %vm1001_vm15, %v5856_v53  ;;  %v6639_v53 = vld [vmem:[#allocation2 + $0x50] sm:$0x1] }
 0x2ee   : > { %4875 = vmatprep.mubr.msk.f32.mxu1 %vm5327_vm0, %v5328_v4  ;;  %v1119_v13 = vrot.slane %v6639_v53, 2 }
 0x2f0   : > { %v1120_v20 = vsel %vm746_vm10, %v1117_v11, %v1119_v13 }
 0x2f1   : > { %4876 = vmatmul.mubr.msk.f32.gmra.mrb[56].mxu1 %vm1001_vm15, %v5870_v57  ;;  %v3983_v57 = vld [vmem:[%s6923_s3 + $0x78] sm:$0xff]  ;;  %v1123_v24 = vsel %vm304_vm1, %v1120_v20, %v1084_v39 }
 0x2f2   : > { %4878 = vmatprep.mubr.msk.f32.mxu1 %vm5327_vm0, %v5328_v4 }
 0x2f5   : > { %4879 = vmatmul.mubr.msk.f32.gmra.mrb[58].mxu1 %vm1001_vm15, %v5884_v60  ;;  %v1103_v60 = vrot.slane %v5309_v55, 2 }
 0x2f6   : > { %4881 = vmatprep.mubr.msk.f32.mxu1 %vm5327_vm0, %v5328_v4 }
 0x2f9   : > { %4882 = vmatmul.mubr.msk.f32.gmra.mrb[60].mxu1 %vm1001_vm15, %v5898_v0  ;;  %v1102_v0 = vrot.slane %v5308_v52, 2 }
 0x2fa   : > { %4884 = vmatprep.mubr.msk.f32.mxu1 %vm5327_vm0, %v5328_v4 }
 0x2fd   : > { %4885 = vmatmul.mubr.msk.f32.gmra.mrb[62].mxu1 %vm1001_vm15, %v6633_v49 }
 0x2fe   : > { %4887 = vmatprep.mubr.msk.f32.mxu1 %vm5327_vm0, %v5328_v4 }
 0x301   : > { %4888 = vmatmul.mubr.msk.f32.gmra.mrb[64].mxu1 %vm1001_vm15, %v6639_v53 }
 0x302   : > { %4892 = vmatprep.mubr.msk.f32.mxu1 %vm5327_vm0, %v5328_v4 }
 0x305   : > { %4893 = vmatmul.mubr.msk.f32.vlgmr.msra.gmra.mrb[44].mxu1 %vm1001_vm15, %v6353_v54  ;;  %v1104_v54 = vsel %vm746_vm10, %v1102_v0, %v1103_v60 }
 0x306   : > { %4926 = vmatpush3.msra.mxu1 %v3983_v57  ;;  %4895 = vmatprep.mubr.msk.f32.mxu1 %vm5327_vm0, %v5328_v4 }
 0x309   : > { %4896 = vmatmul.mubr.msk.f32.gmra.mrb[46].mxu1 %vm1001_vm15, %v6375_v45  ;;  %v1105_v45 = vrot.slane %v5310_v63, 2 }
 0x30a   : > { %4898 = vmatprep.mubr.msk.f32.mxu1 %vm5327_vm0, %v5328_v4 }
 0x30d   : > { %4899 = vmatmul.mubr.msk.f32.gmra.mrb[48].mxu1 %vm1001_vm15, %v6388_v1  ;;  %v5313_v1 = vld [vmem:[#allocation2 + $0x20] sm:$0xff] }
 0x30e   : > { %4901 = vmatprep.mubr.msk.f32.mxu1 %vm5327_vm0, %v5328_v4 }
 0x311   : > { %4902 = vmatmul.mubr.msk.f32.gmra.mrb[50].mxu1 %vm1001_vm15, %v6400_v6  ;;  %v1107_v6 = vrot.slane %v5313_v1, 2 }
 0x312   : > { %4904 = vmatprep.mubr.msk.f32.mxu1 %vm5327_vm0, %v5328_v4 }
 0x315   : > { %4905 = vmatmul.mubr.msk.f32.gmra.mrb[52].mxu1 %vm1001_vm15, %v6412_v8  ;;  %v1108_v8 = vsel %vm746_vm10, %v1105_v45, %v1107_v6 }
 0x316   : > { %4907 = vmatprep.mubr.msk.f32.mxu1 %vm5327_vm0, %v5328_v4 }
 0x319   : > { %4908 = vmatmul.mubr.msk.f32.gmra.mrb[54].mxu1 %vm1001_vm15, %v6424_v12  ;;  %v5314_v12 = vld [vmem:[#allocation2 + $0x28] sm:$0xff] }
 0x31a   : > { %4910 = vmatprep.mubr.msk.f32.mxu1 %vm5327_vm0, %v5328_v4 }
 0x31d   : > { %4911 = vmatmul.mubr.msk.f32.gmra.mrb[56].mxu1 %vm1001_vm15, %v6436_v2  ;;  %v1109_v2 = vrot.slane %v5314_v12, 2 }
 0x31e   : > { %4913 = vmatprep.mubr.msk.f32.mxu1 %vm5327_vm0, %v5328_v4 }
 0x31f   : > { %v1112_v46 = vsel %vm746_vm10, %v1109_v2, %v1111_v42 }
 0x321   : > { %4914 = vmatmul.mubr.msk.f32.gmra.mrb[58].mxu1 %vm1001_vm15, %v6449_v17  ;;  %v1110_v17 = vsel %vm746_vm10, %v1107_v6, %v1109_v2 }
 0x322   : > { %4916 = vmatprep.mubr.msk.f32.mxu1 %vm5327_vm0, %v5328_v4 }
 0x325   : > { %4917 = vmatmul.mubr.msk.f32.gmra.mrb[60].mxu1 %vm1001_vm15, %v6072_v59  ;;  %v1106_v59 = vsel %vm746_vm10, %v1103_v60, %v1105_v45 }
 0x326   : > { %4919 = vmatprep.mubr.msk.f32.mxu1 %vm5327_vm0, %v5328_v4 }
 0x329   : > { %4920 = vmatmul.mubr.msk.f32.gmra.mrb[62].mxu1 %vm1001_vm15, %v5307_v44 }
 0x32a   : > { %4922 = vmatprep.mubr.msk.f32.mxu1 %vm5327_vm0, %v5328_v4 }
 0x32d   : > { %4923 = vmatmul.mubr.msk.f32.gmra.mrb[64].mxu1 %vm1001_vm15, %v5308_v52 }
 0x32e   : > { %4927 = vmatprep.mubr.msk.f32.mxu1 %vm5327_vm0, %v5328_v4 }
 0x331   : > { %4928 = vmatmul.mubr.msk.f32.vlgmr.msra.gmra.mrb[44].mxu1 %vm1001_vm15, %v1104_v54 }
 0x332   : > { %4930 = vmatprep.mubr.msk.f32.mxu1 %vm5327_vm0, %v5328_v4 }
 0x335   : > { %4931 = vmatmul.mubr.msk.f32.gmra.mrb[46].mxu1 %vm1001_vm15, %v1106_v59 }
 0x336   : > { %4933 = vmatprep.mubr.msk.f32.mxu1 %vm5327_vm0, %v5328_v4 }
 0x339   : > { %4934 = vmatmul.mubr.msk.f32.gmra.mrb[48].mxu1 %vm1001_vm15, %v1108_v8 }
 0x33a   : > { %4936 = vmatprep.mubr.msk.f32.mxu1 %vm5327_vm0, %v5328_v4 }
 0x33d   : > { %4937 = vmatmul.mubr.msk.f32.gmra.mrb[50].mxu1 %vm1001_vm15, %v1110_v17 }
 0x33e   : > { %4939 = vmatprep.mubr.msk.f32.mxu1 %vm5327_vm0, %v5328_v4 }
 0x341   : > { %4940 = vmatmul.mubr.msk.f32.gmra.mrb[52].mxu1 %vm1001_vm15, %v1112_v46 }
 0x342   : > { %4942 = vmatprep.mubr.msk.f32.mxu1 %vm5327_vm0, %v5328_v4 }
 0x345   : > { %4943 = vmatmul.mubr.msk.f32.gmra.mrb[54].mxu1 %vm1001_vm15, %v1114_v58 }
 0x346   : > { %4945 = vmatprep.mubr.msk.f32.mxu1 %vm5327_vm0, %v5328_v4 }
 0x349   : > { %4946 = vmatmul.mubr.msk.f32.gmra.mrb[56].mxu1 %vm1001_vm15, %v1116_v7 }
 0x34a   : > { %4948 = vmatprep.mubr.msk.f32.mxu1 %vm5327_vm0, %v5328_v4 }
 0x34d   : > { %4949 = vmatmul.mubr.msk.f32.gmra.mrb[58].mxu1 %vm1001_vm15, %v1118_v37 }
 0x34e   : > { %4951 = vmatprep.mubr.msk.f32.mxu1 %vm5327_vm0, %v5328_v4 }
 0x350   : > { %v2859_v22 = vpop.f32.mrb[44].mxu0 }
 0x351   : > { %v2924_v26 = vmul.f32 %v2859_v22, %v5737_v41  ;;  %v4789_v28 = vpop.f32.mrb[45].mxu0  ;;  %4952 = vmatmul.mubr.msk.f32.gmra.mrb[60].mxu1 %vm1001_vm15, %v1123_v24 }
 0x352   : > { %4954 = vmatprep.mubr.msk.f32.mxu1 %vm5327_vm0, %v5328_v4 }
 0x353   : > { %3936 = vst.msk [vmem:[%s6483_s22 + $0xb0] sm:$0xff] %vm1712_vm5, %v2924_v26  ;;  %v2975_v31 = vmul.f32 %v2924_v26, %v2924_v26  ;;  %v2947_v32 = vsel %vm1712_vm5, %v2924_v26, 0.0 }
 0x354   : > { %v2257_v29 = vpop.f32.mrb[22].mxu1  ;;  %v2864_v27 = vpop.f32.mrb[46].mxu0 }
 0x355   : > { %v2322_v16 = vmul.f32 %v2257_v29, %v5737_v41  ;;  %v2925_v36 = vmul.f32 %v2864_v27, %v5739_v43  ;;  %v4649_v39 = vpop.f32.mrb[23].mxu1  ;;  %v4792_v21 = vpop.f32.mrb[47].mxu0  ;;  %4955 = vmatmul.mubr.msk.f32.gmra.mrb[62].mxu1 %vm1001_vm15, %v6372_v40  ;;  %v2986_v40 = vsel %vm1712_vm5, %v2975_v31, 0.0 }
 0x356   : > { %4957 = vmatprep.mubr.msk.f32.mxu1 %vm5327_vm0, %v5328_v4  ;;  %vm3636_vm0 = vcmask 25600  }
 0x357   : > { %3877 = vst.msk [vmem:[%s6483_s22 + $0x58] sm:$0xff] %vm1712_vm5, %v2322_v16  ;;  %3937 = vst.msk [vmem:[%s6483_s22 + $0xb8] sm:$0xff] %vm1712_vm5, %v2925_v36  ;;  %v2948_v38 = vsel %vm1712_vm5, %v2925_v36, 0.0  ;;  %v2976_v33 = vmul.f32 %v2925_v36, %v2925_v36  ;;  %v2373_v35 = vmul.f32 %v2322_v16, %v2322_v16  ;;  %v2345_v53 = vsel %vm1712_vm5, %v2322_v16, 0.0 }
 0x358   : > { %v2949_v15 = vadd.f32 %v2948_v38, %v2947_v32  ;;  %v2262_v44 = vpop.f32.mrb[24].mxu1  ;;  %v2869_v47 = vpop.f32.mrb[48].mxu0 }
 0x359   : > { %v2987_v52 = vsel %vm1712_vm5, %v2976_v33, 0.0  ;;  %v2323_v4 = vmul.f32 %v2262_v44, %v5739_v43  ;;  %v2926_v55 = vmul.f32 %v2869_v47, %v5746_v51  ;;  %v4652_v63 = vpop.f32.mrb[25].mxu1  ;;  %v4795_v49 = vpop.f32.mrb[49].mxu0  ;;  %4958 = vmatmul.mubr.msk.f32.gmra.mrb[64].mxu1 %vm1001_vm15, %v6349_v18  ;;  %v2384_v59 = vsel %vm1712_vm5, %v2373_v35, 0.0 }
 0x35a   : > { %v2988_v57 = vadd.f32 %v2987_v52, %v2986_v40 }
 0x35b   : > { %3878 = vst.msk [vmem:[%s6483_s22 + $0x60] sm:$0xff] %vm1712_vm5, %v2323_v4  ;;  %v2346_v60 = vsel %vm1712_vm5, %v2323_v4, 0.0  ;;  %v2374_v0 = vmul.f32 %v2323_v4, %v2323_v4  ;;  %3938 = vst.msk [vmem:[%s6483_s22 + $0xc0] sm:$0xff] %vm1712_vm5, %v2926_v55  ;;  %v2950_v54 = vsel %vm1712_vm5, %v2926_v55, 0.0  ;;  %v2977_v45 = vmul.f32 %v2926_v55, %v2926_v55 }
 0x35c   : > { %v2347_v1 = vadd.f32 %v2346_v60, %v2345_v53  ;;  %v2951_v6 = vadd.f32 %v2950_v54, %v2949_v15  ;;  %v2267_v18 = vpop.f32.mrb[26].mxu1  ;;  %v2874_v8 = vpop.f32.mrb[50].mxu0 }
 0x35d   : > { %v2385_v12 = vsel %vm1712_vm5, %v2374_v0, 0.0  ;;  %v2989_v2 = vsel %vm1712_vm5, %v2977_v45, 0.0  ;;  %v2324_v17 = vmul.f32 %v2267_v18, %v5746_v51  ;;  %v2927_v10 = vmul.f32 %v2874_v8, %v5750_v56  ;;  %v4655_v42 = vpop.f32.mrb[27].mxu1  ;;  %v4798_v46 = vpop.f32.mrb[51].mxu0 }
 0x35e   : > { %v2386_v50 = vadd.f32 %v2385_v12, %v2384_v59  ;;  %v2990_v19 = vadd.f32 %v2989_v2, %v2988_v57 }
 0x35f   : > { %3879 = vst.msk [vmem:[%s6483_s22 + $0x68] sm:$0xff] %vm1712_vm5, %v2324_v17  ;;  %v2348_v58 = vsel %vm1712_vm5, %v2324_v17, 0.0  ;;  %v2375_v62 = vmul.f32 %v2324_v17, %v2324_v17  ;;  %3939 = vst.msk [vmem:[%s6483_s22 + $0xc8] sm:$0xff] %vm1712_vm5, %v2927_v10  ;;  %v2952_v5 = vsel %vm1712_vm5, %v2927_v10, 0.0  ;;  %v2978_v7 = vmul.f32 %v2927_v10, %v2927_v10 }
 0x360   : > { %v2349_v11 = vadd.f32 %v2348_v58, %v2347_v1  ;;  %v2953_v13 = vadd.f32 %v2952_v5, %v2951_v6  ;;  %v2272_v37 = vpop.f32.mrb[28].mxu1  ;;  %v2879_v20 = vpop.f32.mrb[52].mxu0 }
 0x361   : > { %v2387_v22 = vsel %vm1712_vm5, %v2375_v62, 0.0  ;;  %v2991_v24 = vsel %vm1712_vm5, %v2978_v7, 0.0  ;;  %v2325_v26 = vmul.f32 %v2272_v37, %v5750_v56  ;;  %v2928_v28 = vmul.f32 %v2879_v20, %v5754_v61  ;;  %v4658_v29 = vpop.f32.mrb[29].mxu1  ;;  %v4801_v27 = vpop.f32.mrb[53].mxu0 }
 0x362   : > { %v2388_v31 = vadd.f32 %v2387_v22, %v2386_v50  ;;  %v2992_v16 = vadd.f32 %v2991_v24, %v2990_v19 }
 0x363   : > { %3880 = vst.msk [vmem:[%s6483_s22 + $0x70] sm:$0xff] %vm1712_vm5, %v2325_v26  ;;  %v2350_v36 = vsel %vm1712_vm5, %v2325_v26, 0.0  ;;  %v2376_v39 = vmul.f32 %v2325_v26, %v2325_v26  ;;  %3940 = vst.msk [vmem:[%s6483_s22 + $0xd0] sm:$0xff] %vm1712_vm5, %v2928_v28  ;;  %v2954_v21 = vsel %vm1712_vm5, %v2928_v28, 0.0  ;;  %v2979_v32 = vmul.f32 %v2928_v28, %v2928_v28 }
 0x364   : > { %v2351_v38 = vadd.f32 %v2350_v36, %v2349_v11  ;;  %v2955_v33 = vadd.f32 %v2954_v21, %v2953_v13  ;;  %v2277_v35 = vpop.f32.mrb[30].mxu1  ;;  %v2884_v15 = vpop.f32.mrb[54].mxu0 }
 0x365   : > { %v2389_v44 = vsel %vm1712_vm5, %v2376_v39, 0.0  ;;  %v2993_v47 = vsel %vm1712_vm5, %v2979_v32, 0.0  ;;  %v2326_v40 = vmul.f32 %v2277_v35, %v5754_v61  ;;  %v2929_v52 = vmul.f32 %v2884_v15, %v5758_v3  ;;  %v4661_v4 = vpop.f32.mrb[31].mxu1  ;;  %v4804_v55 = vpop.f32.mrb[55].mxu0 }
 0x366   : > { %v2390_v63 = vadd.f32 %v2389_v44, %v2388_v31  ;;  %v2994_v49 = vadd.f32 %v2993_v47, %v2992_v16 }
 0x367   : > { %3881 = vst.msk [vmem:[%s6483_s22 + $0x78] sm:$0xff] %vm1712_vm5, %v2326_v40  ;;  %v2352_v53 = vsel %vm1712_vm5, %v2326_v40, 0.0  ;;  %v2377_v57 = vmul.f32 %v2326_v40, %v2326_v40  ;;  %3941 = vst.msk [vmem:[%s6483_s22 + $0xd8] sm:$0xff] %vm1712_vm5, %v2929_v52  ;;  %v2956_v60 = vsel %vm1712_vm5, %v2929_v52, 0.0  ;;  %v2980_v0 = vmul.f32 %v2929_v52, %v2929_v52 }
 0x368   : > { %v2353_v54 = vadd.f32 %v2352_v53, %v2351_v38  ;;  %v2957_v45 = vadd.f32 %v2956_v60, %v2955_v33  ;;  %v2282_v59 = vpop.f32.mrb[32].mxu1  ;;  %v2889_v1 = vpop.f32.mrb[56].mxu0 }
 0x369   : > { %v2391_v6 = vsel %vm1712_vm5, %v2377_v57, 0.0  ;;  %v2995_v18 = vsel %vm1712_vm5, %v2980_v0, 0.0  ;;  %v2327_v8 = vmul.f32 %v2282_v59, %v5758_v3  ;;  %v2930_v12 = vmul.f32 %v2889_v1, %v5762_v9  ;;  %v4664_v2 = vpop.f32.mrb[33].mxu1  ;;  %v4807_v17 = vpop.f32.mrb[57].mxu0 }
 0x36a   : > { %v2392_v10 = vadd.f32 %v2391_v6, %v2390_v63  ;;  %v2996_v42 = vadd.f32 %v2995_v18, %v2994_v49 }
 0x36b   : > { %3882 = vst.msk [vmem:[%s6483_s22 + $0x80] sm:$0xff] %vm1712_vm5, %v2327_v8  ;;  %v2354_v46 = vsel %vm1712_vm5, %v2327_v8, 0.0  ;;  %v2378_v50 = vmul.f32 %v2327_v8, %v2327_v8  ;;  %3942 = vst.msk [vmem:[%s6483_s22 + $0xe0] sm:$0xff] %vm1712_vm5, %v2930_v12  ;;  %v2958_v19 = vsel %vm1712_vm5, %v2930_v12, 0.0  ;;  %v2981_v58 = vmul.f32 %v2930_v12, %v2930_v12 }
 0x36c   : > { %v2355_v62 = vadd.f32 %v2354_v46, %v2353_v54  ;;  %v2959_v5 = vadd.f32 %v2958_v19, %v2957_v45  ;;  %v2287_v7 = vpop.f32.mrb[34].mxu1  ;;  %v2894_v11 = vpop.f32.mrb[58].mxu0  ;;  %v1785_v19 = vrot.slane %v6592_v25, 4 }
 0x36d   : > { %v2393_v13 = vsel %vm1712_vm5, %v2378_v50, 0.0  ;;  %v2997_v37 = vsel %vm1712_vm5, %v2981_v58, 0.0  ;;  %v2328_v20 = vmul.f32 %v2287_v7, %v5762_v9  ;;  %v2931_v22 = vmul.f32 %v2894_v11, %v5766_v14  ;;  %v4667_v24 = vpop.f32.mrb[35].mxu1  ;;  %v4810_v26 = vpop.f32.mrb[59].mxu0 }
 0x36e   : > { %v2394_v28 = vadd.f32 %v2393_v13, %v2392_v10  ;;  %v2998_v29 = vadd.f32 %v2997_v37, %v2996_v42  ;;  %v1746_v50 = vrot.slane %v6587_v34, 4 }
 0x36f   : > { %3883 = vst.msk [vmem:[%s6483_s22 + $0x88] sm:$0xff] %vm1712_vm5, %v2328_v20  ;;  %v2356_v27 = vsel %vm1712_vm5, %v2328_v20, 0.0  ;;  %v2379_v31 = vmul.f32 %v2328_v20, %v2328_v20  ;;  %3943 = vst.msk [vmem:[%s6483_s22 + $0xe8] sm:$0xff] %vm1712_vm5, %v2931_v22  ;;  %v2960_v16 = vsel %vm1712_vm5, %v2931_v22, 0.0  ;;  %v2982_v36 = vmul.f32 %v2931_v22, %v2931_v22 }
 0x370   : > { %v2357_v39 = vadd.f32 %v2356_v27, %v2355_v62  ;;  %v2961_v21 = vadd.f32 %v2960_v16, %v2959_v5  ;;  %v2292_v32 = vpop.f32.mrb[36].mxu1  ;;  %v2899_v38 = vpop.f32.mrb[60].mxu0 }
 0x371   : > { %v2395_v33 = vsel %vm1712_vm5, %v2379_v31, 0.0  ;;  %v2999_v35 = vsel %vm1712_vm5, %v2982_v36, 0.0  ;;  %v2329_v15 = vmul.f32 %v2292_v32, %v5766_v14  ;;  %v2932_v44 = vmul.f32 %v2899_v38, %v5770_v23  ;;  %v4670_v47 = vpop.f32.mrb[37].mxu1  ;;  %v4813_v40 = vpop.f32.mrb[61].mxu0 }
 0x372   : > { %v2396_v52 = vadd.f32 %v2395_v33, %v2394_v28  ;;  %v3000_v4 = vadd.f32 %v2999_v35, %v2998_v29  ;;  %v1747_v36 = vadd.f32 %v1746_v50, %v6587_v34  ;;  %v1786_v38 = vadd.f32 %v1785_v19, %v6592_v25 }
 0x373   : > { %3884 = vst.msk [vmem:[%s6483_s22 + $0x90] sm:$0xff] %vm1712_vm5, %v2329_v15  ;;  %v2358_v55 = vsel %vm1712_vm5, %v2329_v15, 0.0  ;;  %v2380_v63 = vmul.f32 %v2329_v15, %v2329_v15  ;;  %3944 = vst.msk [vmem:[%s6483_s22 + $0xf0] sm:$0xff] %vm1712_vm5, %v2932_v44  ;;  %v2962_v49 = vsel %vm1712_vm5, %v2932_v44, 0.0  ;;  %v2983_v53 = vmul.f32 %v2932_v44, %v2932_v44 }
 0x374   : > { %v2359_v57 = vadd.f32 %v2358_v55, %v2357_v39  ;;  %v2963_v60 = vadd.f32 %v2962_v49, %v2961_v21  ;;  %v2297_v0 = vpop.f32.mrb[38].mxu1  ;;  %v2904_v54 = vpop.f32.mrb[62].mxu0  ;;  %v1748_v55 = vrot.slane %v1747_v36, 2  ;;  %v1787_v25 = vrot.slane %v1786_v38, 2 }
 0x375   : > { %v2397_v45 = vsel %vm1712_vm5, %v2380_v63, 0.0  ;;  %v3001_v59 = vsel %vm1712_vm5, %v2983_v53, 0.0  ;;  %v2330_v1 = vmul.f32 %v2297_v0, %v5770_v23  ;;  %v2933_v6 = vmul.f32 %v2904_v54, %v5774_v30  ;;  %v4673_v18 = vpop.f32.mrb[39].mxu1  ;;  %v4816_v8 = vpop.f32.mrb[63].mxu0 }
 0x376   : > { %v2398_v12 = vadd.f32 %v2397_v45, %v2396_v52  ;;  %v3002_v2 = vadd.f32 %v3001_v59, %v3000_v4  ;;  %v1749_v59 = vadd.f32 %v1748_v55, %v1747_v36  ;;  %v1788_v8 = vadd.f32 %v1787_v25, %v1786_v38 }
 0x377   : > { %3885 = vst.msk [vmem:[%s6483_s22 + $0x98] sm:$0xff] %vm1712_vm5, %v2330_v1  ;;  %v2360_v17 = vsel %vm1712_vm5, %v2330_v1, 0.0  ;;  %v2381_v10 = vmul.f32 %v2330_v1, %v2330_v1  ;;  %3945 = vst.msk [vmem:[%s6483_s22 + $0xf8] sm:$0xff] %vm1712_vm5, %v2933_v6  ;;  %v2964_v42 = vsel %vm1712_vm5, %v2933_v6, 0.0  ;;  %v2984_v46 = vmul.f32 %v2933_v6, %v2933_v6 }
 0x378   : > { %v2361_v58 = vadd.f32 %v2360_v17, %v2359_v57  ;;  %v2965_v62 = vadd.f32 %v2964_v42, %v2963_v60  ;;  %v2302_v5 = vpop.f32.mrb[40].mxu1  ;;  %v2909_v7 = vpop.f32.mrb[64].mxu0  ;;  %v1789_v19 = vrot.slane %v1788_v8, 1 }
 0x379   : > { %v2399_v11 = vsel %vm1712_vm5, %v2381_v10, 0.0  ;;  %v3003_v13 = vsel %vm1712_vm5, %v2984_v46, 0.0  ;;  %v2331_v37 = vmul.f32 %v2302_v5, %v5774_v30  ;;  %v2934_v20 = vmul.f32 %v2909_v7, %v5743_v48  ;;  %v4676_v22 = vpop.f32.mrb[41].mxu1  ;;  %v4819_v24 = vpop.f32.mrb[65].mxu0 }
 0x37a   : > { %v2400_v26 = vadd.f32 %v2399_v11, %v2398_v12  ;;  %v3004_v28 = vadd.f32 %v3003_v13, %v3002_v2  ;;  %v1750_v10 = vrot.slane %v1749_v59, 1 }
 0x37b   : > { %3886 = vst.msk [vmem:[%s6483_s22 + $0xa0] sm:$0xff] %vm1712_vm5, %v2331_v37  ;;  %v2362_v29 = vsel %vm1712_vm5, %v2331_v37, 0.0  ;;  %v2382_v27 = vmul.f32 %v2331_v37, %v2331_v37  ;;  %v2966_v31 = vsel %vm1723_vm6, %v2934_v20, 0.0  ;;  %v2985_v16 = vmul.f32 %v2934_v20, %v2934_v20 }
 0x37c   : > { %3946 = vst.msk [vmem:[%s6483_s22 + $0x100] sm:$0x1] %vm1723_vm6, %v2934_v20  ;;  %v2363_v39 = vadd.f32 %v2362_v29, %v2361_v58  ;;  %v2967_v21 = vadd.f32 %v2966_v31, %v2965_v62  ;;  %v2307_v32 = vpop.f32.mrb[42].mxu1  ;;  %v1751_v7 = vadd.f32 %v1750_v10, %v1749_v59  ;;  %v1790_v20 = vadd.f32 %v1789_v19, %v1788_v8 }
 0x37d   : > { %v2401_v33 = vsel %vm1712_vm5, %v2382_v27, 0.0  ;;  %v3005_v35 = vsel %vm1723_vm6, %v2985_v16, 0.0  ;;  %v2332_v15 = vmul.f32 %v2307_v32, %v5743_v48  ;;  %v4679_v44 = vpop.f32.mrb[43].mxu1 }
 0x37e   : > { %v2402_v47 = vadd.f32 %v2401_v33, %v2400_v26  ;;  %v2968_v40 = vrot.slane %v2967_v21, 4  ;;  %v3006_v52 = vadd.f32 %v3005_v35, %v3004_v28 }
 0x37f   : > { %3887 = vst.msk [vmem:[%s6483_s22 + $0xa8] sm:$0x1] %vm1723_vm6, %v2332_v15  ;;  %v2364_v4 = vsel %vm1723_vm6, %v2332_v15, 0.0  ;;  %v2383_v34 = vmul.f32 %v2332_v15, %v2332_v15 }
 0x380   : > { %v2969_v63 = vadd.f32 %v2968_v40, %v2967_v21  ;;  %v3007_v49 = vrot.slane %v3006_v52, 4  ;;  %v2365_v53 = vadd.f32 %v2364_v4, %v2363_v39 }
 0x381   : > { %v2403_v57 = vsel %vm1723_vm6, %v2383_v34, 0.0 }
 0x382   : > { %v2970_v60 = vrot.slane %v2969_v63, 2  ;;  %v3008_v0 = vadd.f32 %v3007_v49, %v3006_v52  ;;  %v2366_v54 = vrot.slane %v2365_v53, 4  ;;  %v2404_v45 = vadd.f32 %v2403_v57, %v2402_v47 }
 0x384   : > { %v3009_v1 = vrot.slane %v3008_v0, 2  ;;  %v2367_v6 = vadd.f32 %v2366_v54, %v2365_v53  ;;  %v2405_v18 = vrot.slane %v2404_v45, 4  ;;  %v2971_v12 = vadd.f32 %v2970_v60, %v2969_v63 }
 0x386   : > { %v2368_v2 = vrot.slane %v2367_v6, 2  ;;  %v2406_v17 = vadd.f32 %v2405_v18, %v2404_v45  ;;  %v3010_v42 = vadd.f32 %v3009_v1, %v3008_v0  ;;  %v2972_v58 = vrot.slane %v2971_v12, 1 }
 0x388   : > { %v2369_v46 = vadd.f32 %v2368_v2, %v2367_v6  ;;  %v2407_v50 = vrot.slane %v2406_v17, 2  ;;  %v3011_v11 = vrot.slane %v3010_v42, 1  ;;  %v2973_v22 = vadd.f32 %v2972_v58, %v2971_v12 }
 0x38a   : > { %v2370_v62 = vrot.slane %v2369_v46, 1  ;;  %v2408_v5 = vadd.f32 %v2407_v50, %v2406_v17  ;;  %v3012_v28 = vadd.f32 %v3011_v11, %v3010_v42 }
 0x38c   : > { %v2371_v13 = vadd.f32 %v2370_v62, %v2369_v46  ;;  %v2409_v37 = vrot.slane %v2408_v5, 1 }
 0x38e   : > { %v2372_v24 = vadd.f32 %v2371_v13, %v1751_v7  ;;  %v2410_v26 = vadd.f32 %v2409_v37, %v2408_v5 }
 0x390   : > { %v2411_v29 = vadd.f32 %v2410_v26, %v1790_v20  ;;  %v6851_v27 = vadd.f32 %v2973_v22, %v2372_v24 }
 0x392   : > { %v6853_v31 = vadd.f32 %v3012_v28, %v2411_v29 }
 0x404   : > { %v3480_v16 = vpop.f32.mrb[44].mxu1 }
 0x405   : > { %v3545_v36 = vmul.f32 %v3480_v16, %v5737_v41  ;;  %v4929_v39 = vpop.f32.mrb[45].mxu1 }
 0x407   : > { %3995 = vst.msk [vmem:[%s6483_s22 + $0x108] sm:$0xff] %vm1712_vm5, %v3545_v36  ;;  %v3596_v32 = vmul.f32 %v3545_v36, %v3545_v36  ;;  %v3568_v35 = vsel %vm1712_vm5, %v3545_v36, 0.0 }
 0x408   : > { %v3485_v21 = vpop.f32.mrb[46].mxu1 }
 0x409   : > { %v3546_v38 = vmul.f32 %v3485_v21, %v5739_v43  ;;  %v4932_v33 = vpop.f32.mrb[47].mxu1  ;;  %v3607_v41 = vsel %vm1712_vm5, %v3596_v32, 0.0 }
 0x40b   : > { %3996 = vst.msk [vmem:[%s6483_s22 + $0x110] sm:$0xff] %vm1712_vm5, %v3546_v38  ;;  %v3569_v15 = vsel %vm1712_vm5, %v3546_v38, 0.0  ;;  %v3597_v44 = vmul.f32 %v3546_v38, %v3546_v38 }
 0x40c   : > { %v3570_v47 = vadd.f32 %v3569_v15, %v3568_v35  ;;  %v3490_v40 = vpop.f32.mrb[48].mxu1 }
 0x40d   : > { %v3608_v52 = vsel %vm1712_vm5, %v3597_v44, 0.0  ;;  %v3547_v4 = vmul.f32 %v3490_v40, %v5746_v51  ;;  %v4935_v34 = vpop.f32.mrb[49].mxu1 }
 0x40e   : > { %v3609_v55 = vadd.f32 %v3608_v52, %v3607_v41 }
 0x40f   : > { %3997 = vst.msk [vmem:[%s6483_s22 + $0x118] sm:$0xff] %vm1712_vm5, %v3547_v4  ;;  %v3571_v43 = vsel %vm1712_vm5, %v3547_v4, 0.0  ;;  %v3598_v63 = vmul.f32 %v3547_v4, %v3547_v4 }
 0x410   : > { %v3572_v49 = vadd.f32 %v3571_v43, %v3570_v47  ;;  %v3495_v53 = vpop.f32.mrb[50].mxu1 }
 0x411   : > { %v3610_v25 = vsel %vm1712_vm5, %v3598_v63, 0.0  ;;  %v3548_v57 = vmul.f32 %v3495_v53, %v5750_v56  ;;  %v4938_v60 = vpop.f32.mrb[51].mxu1 }
 0x412   : > { %v3611_v0 = vadd.f32 %v3610_v25, %v3609_v55 }
 0x413   : > { %3998 = vst.msk [vmem:[%s6483_s22 + $0x120] sm:$0xff] %vm1712_vm5, %v3548_v57  ;;  %v3573_v51 = vsel %vm1712_vm5, %v3548_v57, 0.0  ;;  %v3599_v54 = vmul.f32 %v3548_v57, %v3548_v57 }
 0x414   : > { %v3574_v45 = vadd.f32 %v3573_v51, %v3572_v49  ;;  %v3500_v59 = vpop.f32.mrb[52].mxu1 }
 0x415   : > { %v3612_v1 = vsel %vm1712_vm5, %v3599_v54, 0.0  ;;  %v3549_v6 = vmul.f32 %v3500_v59, %v5754_v61  ;;  %v4941_v18 = vpop.f32.mrb[53].mxu1 }
 0x416   : > { %v3613_v8 = vadd.f32 %v3612_v1, %v3611_v0 }
 0x417   : > { %3999 = vst.msk [vmem:[%s6483_s22 + $0x128] sm:$0xff] %vm1712_vm5, %v3549_v6  ;;  %v3575_v56 = vsel %vm1712_vm5, %v3549_v6, 0.0  ;;  %v3600_v12 = vmul.f32 %v3549_v6, %v3549_v6 }
 0x418   : > { %v3576_v2 = vadd.f32 %v3575_v56, %v3574_v45  ;;  %v3505_v17 = vpop.f32.mrb[54].mxu1 }
 0x419   : > { %v3614_v10 = vsel %vm1712_vm5, %v3600_v12, 0.0  ;;  %v3550_v42 = vmul.f32 %v3505_v17, %v5758_v3  ;;  %v4944_v46 = vpop.f32.mrb[55].mxu1 }
 0x41a   : > { %v3615_v50 = vadd.f32 %v3614_v10, %v3613_v8 }
 0x41b   : > { %4000 = vst.msk [vmem:[%s6483_s22 + $0x130] sm:$0xff] %vm1712_vm5, %v3550_v42  ;;  %v3577_v61 = vsel %vm1712_vm5, %v3550_v42, 0.0  ;;  %v3601_v19 = vmul.f32 %v3550_v42, %v3550_v42 }
 0x41c   : > { %v3578_v58 = vadd.f32 %v3577_v61, %v3576_v2  ;;  %v3510_v62 = vpop.f32.mrb[56].mxu1 }
 0x41d   : > { %v3616_v5 = vsel %vm1712_vm5, %v3601_v19, 0.0  ;;  %v3551_v7 = vmul.f32 %v3510_v62, %v5762_v9  ;;  %v4947_v11 = vpop.f32.mrb[57].mxu1 }
 0x41e   : > { %v3617_v13 = vadd.f32 %v3616_v5, %v3615_v50 }
 0x41f   : > { %4001 = vst.msk [vmem:[%s6483_s22 + $0x138] sm:$0xff] %vm1712_vm5, %v3551_v7  ;;  %v3579_v3 = vsel %vm1712_vm5, %v3551_v7, 0.0  ;;  %v3602_v37 = vmul.f32 %v3551_v7, %v3551_v7 }
 0x420   : > { %v3580_v20 = vadd.f32 %v3579_v3, %v3578_v58  ;;  %v3515_v22 = vpop.f32.mrb[58].mxu1 }
 0x421   : > { %v3618_v24 = vsel %vm1712_vm5, %v3602_v37, 0.0  ;;  %v3552_v26 = vmul.f32 %v3515_v22, %v5766_v14  ;;  %v4950_v28 = vpop.f32.mrb[59].mxu1 }
 0x422   : > { %v3619_v29 = vadd.f32 %v3618_v24, %v3617_v13 }
 0x423   : > { %4002 = vst.msk [vmem:[%s6483_s22 + $0x140] sm:$0xff] %vm1712_vm5, %v3552_v26  ;;  %v3581_v9 = vsel %vm1712_vm5, %v3552_v26, 0.0  ;;  %v3603_v16 = vmul.f32 %v3552_v26, %v3552_v26 }
 0x424   : > { %v3582_v36 = vadd.f32 %v3581_v9, %v3580_v20  ;;  %v3520_v39 = vpop.f32.mrb[60].mxu1 }
 0x425   : > { %v3620_v21 = vsel %vm1712_vm5, %v3603_v16, 0.0  ;;  %v3553_v32 = vmul.f32 %v3520_v39, %v5770_v23  ;;  %v4953_v38 = vpop.f32.mrb[61].mxu1 }
 0x426   : > { %v3621_v33 = vadd.f32 %v3620_v21, %v3619_v29 }
 0x427   : > { %4003 = vst.msk [vmem:[%s6483_s22 + $0x148] sm:$0xff] %vm1712_vm5, %v3553_v32  ;;  %v3583_v14 = vsel %vm1712_vm5, %v3553_v32, 0.0  ;;  %v3604_v35 = vmul.f32 %v3553_v32, %v3553_v32 }
 0x428   : > { %v3584_v15 = vadd.f32 %v3583_v14, %v3582_v36  ;;  %v3525_v44 = vpop.f32.mrb[62].mxu1 }
 0x429   : > { %v3622_v47 = vsel %vm1712_vm5, %v3604_v35, 0.0  ;;  %v3554_v40 = vmul.f32 %v3525_v44, %v5774_v30  ;;  %v4956_v41 = vpop.f32.mrb[63].mxu1 }
 0x42a   : > { %v3623_v52 = vadd.f32 %v3622_v47, %v3621_v33 }
 0x42b   : > { %4004 = vst.msk [vmem:[%s6483_s22 + $0x150] sm:$0xff] %vm1712_vm5, %v3554_v40  ;;  %v3585_v23 = vsel %vm1712_vm5, %v3554_v40, 0.0  ;;  %v3605_v4 = vmul.f32 %v3554_v40, %v3554_v40 }
 0x42c   : > { %v3586_v34 = vadd.f32 %v3585_v23, %v3584_v15  ;;  %v3530_v55 = vpop.f32.mrb[64].mxu1 }
 0x42d   : > { %v3624_v43 = vsel %vm1712_vm5, %v3605_v4, 0.0  ;;  %v3555_v63 = vmul.f32 %v3530_v55, %v5743_v48  ;;  %v4959_v49 = vpop.f32.mrb[65].mxu1 }
 0x42e   : > { %v3625_v53 = vadd.f32 %v3624_v43, %v3623_v52 }
 0x42f   : > { %4005 = vst.msk [vmem:[%s6483_s22 + $0x158] sm:$0x1] %vm1723_vm6, %v3555_v63  ;;  %v3587_v25 = vsel %vm1723_vm6, %v3555_v63, 0.0  ;;  %v3606_v30 = vmul.f32 %v3555_v63, %v3555_v63 }
 0x430   : > { %v3588_v57 = vadd.f32 %v3587_v25, %v3586_v34 }
 0x431   : > { %v3626_v60 = vsel %vm1723_vm6, %v3606_v30, 0.0 }
 0x432   : > { %v3589_v0 = vrot.slane %v3588_v57, 4  ;;  %v3627_v51 = vadd.f32 %v3626_v60, %v3625_v53 }
 0x434   : > { %v3590_v54 = vadd.f32 %v3589_v0, %v3588_v57  ;;  %v3628_v45 = vrot.slane %v3627_v51, 4 }
 0x436   : > { %v3591_v59 = vrot.slane %v3590_v54, 2  ;;  %v3629_v1 = vadd.f32 %v3628_v45, %v3627_v51 }
 0x438   : > { %v3592_v6 = vadd.f32 %v3591_v59, %v3590_v54  ;;  %v3630_v18 = vrot.slane %v3629_v1, 2 }
 0x43a   : > { %v3593_v48 = vrot.slane %v3592_v6, 1  ;;  %v3631_v8 = vadd.f32 %v3630_v18, %v3629_v1 }
 0x43c   : > { %v3594_v56 = vadd.f32 %v3593_v48, %v3592_v6  ;;  %v3632_v12 = vrot.slane %v3631_v8, 1 }
 0x43e   : > { %v3595_v2 = vadd.f32 %v3594_v56, %v6851_v27  ;;  %v3633_v17 = vadd.f32 %v3632_v12, %v3631_v8 }
 0x440   : > { %v3634_v10 = vadd.f32 %v3633_v17, %v6853_v31 }
 0x442   : > { %v3635_v42 = vsel %vm1028_vm3, %v3595_v2, %v3634_v10 }
 0x443   : > { %3637 = vst.msk [vmem:[%s235_s7] sm:$0x3] %vm3636_vm0, %v3635_v42 }
 0x444 PF: > { %s16_s18 = sadd.s32 1, %s5324_s18  }
 0x445   : > { %p13_p4 = scmp.ge.s32.totalorder %s16_s18, 4  }
 0x447   :  { %15 = sbr.rel (!%p13_p4) target bundleno = 1 (0x1), region = 99 }

</bundles_post_ra>
